<compile_context>
chip_gen: v7x
topology: tpu7x:2x2x1
jax: 0.10.0
libtpu: 0.0.40
codegen_flags: <defaults>
</compile_context>

<pallas_src>
import jax
import jax.numpy as jnp
from jax import lax
from jax.experimental import pallas as pl
from jax.experimental.pallas import tpu as pltpu

CHEB_K = 5          # Chebyshev order (K=5)
HID = 30            # ChebConv / lin1 hidden size (torch spec)
F_PAD = 128         # padded input-feature lanes
H_PAD = 128         # padded hidden lanes
C_PAD = 128         # padded class lanes
LANE = 128
SUBLANE = 8
VMEM_LIMIT = 32 * 1024 * 1024   # safe on v5e/v6e/v7x


def _round_up(x, m):
    return ((x + m - 1) // m) * m


def _pad(a, shape):
    pads = [(0, t - s) for s, t in zip(a.shape, shape)]
    return jnp.pad(a, pads)


# ----------------------------------------------------------------------------
# Kernel 1: fused embedding = ChebConv(K=5)+ReLU  ->  ChebConv(K=5)+ReLU
#   l_ref  : [Np, Np]  bf16   scaled Laplacian L_hat = -D^-1/2 A D^-1/2
#   x_ref  : [Np, Fp]  f32    node features (zero padded)
#   w1_ref : [K, Fp, Hp] f32  ChebConv-1 weights (zero padded)
#   b1_ref : [1, Hp]   f32
#   w2_ref : [K, Hp, Hp] f32  ChebConv-2 weights
#   b2_ref : [1, Hp]   f32
#   h_ref  : [Np, Hp]  f32    output node embedding
# ----------------------------------------------------------------------------
def _cheb_embed_kernel(l_ref, x_ref, w1_ref, b1_ref, w2_ref, b2_ref, h_ref):
    l_bf = l_ref[...]   # (Np, Np) bf16, resident in VMEM for both layers

    def cheb_layer(x_in, w_ref, b_ref):
        # out = sum_k T_k(L_hat) @ x_in @ W_k + b, then ReLU.
        tx_prev = x_in                                              # T_0 x
        out = jnp.dot(tx_prev, w_ref[0], preferred_element_type=jnp.float32)
        tx_cur = jnp.dot(l_bf, tx_prev.astype(jnp.bfloat16),
                         preferred_element_type=jnp.float32)        # T_1 x
        out = out + jnp.dot(tx_cur, w_ref[1], preferred_element_type=jnp.float32)
        # static K=5 -> fully unrolled at trace time (LLO gets full visibility)
        for k in range(2, CHEB_K):
            tx_new = 2.0 * jnp.dot(l_bf, tx_cur.astype(jnp.bfloat16),
                                   preferred_element_type=jnp.float32) - tx_prev
            out = out + jnp.dot(tx_new, w_ref[k],
                                preferred_element_type=jnp.float32)
            tx_prev, tx_cur = tx_cur, tx_new
        return jnp.maximum(out + b_ref[...], 0.0)

    h1 = cheb_layer(x_ref[...], w1_ref, b1_ref)      # (Np, Hp)
    h_ref[...] = cheb_layer(h1, w2_ref, b2_ref)      # (Np, Hp)


def cheb_embed(l_hat_bf16, x_pad, w1, b1, w2, b2):
    n_pad = x_pad.shape[0]
    return pl.pallas_call(
        _cheb_embed_kernel,
        out_shape=jax.ShapeDtypeStruct((n_pad, H_PAD), jnp.float32),
        compiler_params=pltpu.CompilerParams(vmem_limit_bytes=VMEM_LIMIT),
    )(l_hat_bf16, x_pad, w1, b1, w2, b2)


# ----------------------------------------------------------------------------
# Kernel 2: fused global_mean_pool + relu(lin1) + lin2
#   m_ref  : [Gp, Np] f32   mean-pooling matrix (1/count per node, 0 elsewhere)
#   h_ref  : [Np, Hp] f32   node embeddings
#   w1_ref : [Hp, Hp] f32   lin1 weight^T (padded)
#   b1_ref : [1, Hp]
#   w2_ref : [Hp, Cp] f32   lin2 weight^T (padded)
#   b2_ref : [1, Cp]
#   o_ref  : [Gp, Cp] f32
# ----------------------------------------------------------------------------
def _pool_mlp_kernel(m_ref, h_ref, w1_ref, b1_ref, w2_ref, b2_ref, o_ref):
    pooled = jnp.dot(m_ref[...], h_ref[...],
                     preferred_element_type=jnp.float32)            # (Gp, Hp)
    z = jnp.maximum(
        jnp.dot(pooled, w1_ref[...], preferred_element_type=jnp.float32)
        + b1_ref[...], 0.0)
    o_ref[...] = (jnp.dot(z, w2_ref[...], preferred_element_type=jnp.float32)
                  + b2_ref[...])


def pool_mlp(m_pad, h_pad, w1, b1, w2, b2):
    g_pad = m_pad.shape[0]
    return pl.pallas_call(
        _pool_mlp_kernel,
        out_shape=jax.ShapeDtypeStruct((g_pad, C_PAD), jnp.float32),
        compiler_params=pltpu.CompilerParams(vmem_limit_bytes=VMEM_LIMIT),
    )(m_pad, h_pad, w1, b1, w2, b2)


# ----------------------------------------------------------------------------
# Plain-JAX glue: scaled Laplacian, pooling matrix, params, forward
# ----------------------------------------------------------------------------
def build_cheb_laplacian(edge_index, edge_weight, num_nodes, n_pad):
    # PyG ChebConv (normalization='sym', lambda_max=2.0):
    #   L_hat = 2/lambda_max * (I - D^-1/2 A D^-1/2) - I = -D^-1/2 A D^-1/2
    src, dst = edge_index[0], edge_index[1]
    adj = jnp.zeros((num_nodes, num_nodes), jnp.float32)
    adj = adj.at[dst, src].add(edge_weight)
    deg = jnp.sum(adj, axis=1)
    d_inv_sqrt = jnp.where(deg > 0, lax.rsqrt(deg), 0.0)
    l_hat = -(d_inv_sqrt[:, None] * adj * d_inv_sqrt[None, :])
    return _pad(l_hat, (n_pad, n_pad))


def build_mean_pool(batch, num_graphs, num_nodes, g_pad, n_pad):
    one_hot = (batch[None, :] == jnp.arange(num_graphs)[:, None]).astype(jnp.float32)
    counts = jnp.maximum(jnp.sum(one_hot, axis=1, keepdims=True), 1.0)
    return _pad(one_hot / counts, (g_pad, n_pad))


def init_params(key, num_features, num_classes):
    ks = jax.random.split(key, 8)
    sc = 0.1
    return {
        "cheb1_w": sc * jax.random.normal(ks[0], (CHEB_K, num_features, HID), jnp.float32),
        "cheb1_b": sc * jax.random.normal(ks[1], (HID,), jnp.float32),
        "cheb2_w": sc * jax.random.normal(ks[2], (CHEB_K, HID, HID), jnp.float32),
        "cheb2_b": sc * jax.random.normal(ks[3], (HID,), jnp.float32),
        "lin1_w_t": sc * jax.random.normal(ks[4], (HID, HID), jnp.float32),
        "lin1_b": sc * jax.random.normal(ks[5], (HID,), jnp.float32),
        "lin2_w_t": sc * jax.random.normal(ks[6], (HID, num_classes), jnp.float32),
        "lin2_b": jnp.zeros((num_classes,), jnp.float32),
    }


def pad_params(p):
    return {
        "cheb1_w": _pad(p["cheb1_w"], (CHEB_K, F_PAD, H_PAD)),
        "cheb1_b": _pad(p["cheb1_b"].reshape(1, -1), (1, H_PAD)),
        "cheb2_w": _pad(p["cheb2_w"], (CHEB_K, H_PAD, H_PAD)),
        "cheb2_b": _pad(p["cheb2_b"].reshape(1, -1), (1, H_PAD)),
        "lin1_w_t": _pad(p["lin1_w_t"], (H_PAD, H_PAD)),
        "lin1_b": _pad(p["lin1_b"].reshape(1, -1), (1, H_PAD)),
        "lin2_w_t": _pad(p["lin2_w_t"], (H_PAD, C_PAD)),
        "lin2_b": _pad(p["lin2_b"].reshape(1, -1), (1, C_PAD)),
    }


def forward(x, edge_index, edge_weight, batch, num_graphs, params):
    n = x.shape[0]
    num_classes = params["lin2_w_t"].shape[1]
    n_pad = _round_up(n, LANE)          # N is a lane dim of L_hat and M
    g_pad = _round_up(num_graphs, SUBLANE)

    l_hat = build_cheb_laplacian(edge_index, edge_weight, n, n_pad).astype(jnp.bfloat16)
    x_pad = _pad(x.astype(jnp.float32), (n_pad, F_PAD))
    m_pad = build_mean_pool(batch, num_graphs, n, g_pad, n_pad)
    pp = pad_params(params)

    # embedding: two fused ChebConv(K=5)+ReLU layers (L_hat read from HBM once)
    h = cheb_embed(l_hat, x_pad, pp["cheb1_w"], pp["cheb1_b"],
                   pp["cheb2_w"], pp["cheb2_b"])

    # global mean pool + MLP head
    out = pool_mlp(m_pad, h, pp["lin1_w_t"], pp["lin1_b"],
                   pp["lin2_w_t"], pp["lin2_b"])
    return out[:num_graphs, :num_classes]


if __name__ == "__main__":
    num_features = 3
    num_classes = 2
    nodes_per_graph = 8
    num_graphs = 2
    n_nodes = nodes_per_graph * num_graphs

    # two small "house-like" graphs: an 8-cycle plus one chord, undirected
    src, dst = [], []
    for g in range(num_graphs):
        c = g * nodes_per_graph
        for i in range(nodes_per_graph):
            j = (i + 1) % nodes_per_graph
            src += [c + i, c + j]
            dst += [c + j, c + i]
        src += [c + 0, c + 4]   # chord ("roof")
        dst += [c + 4, c + 0]
    edge_index = jnp.array([src, dst], dtype=jnp.int32)
    edge_weight = jnp.ones((edge_index.shape[1],), jnp.float32)
    batch = jnp.repeat(jnp.arange(num_graphs, dtype=jnp.int32), nodes_per_graph)

    key = jax.random.PRNGKey(0)
    k_x, k_p = jax.random.split(key)
    x = jax.random.normal(k_x, (n_nodes, num_features), jnp.float32)
    params = init_params(k_p, num_features, num_classes)

    out = forward(x, edge_index, edge_weight, batch, num_graphs, params)
    out = jax.block_until_ready(out)
    assert out.shape == (num_graphs, num_classes)
    assert bool(jnp.all(jnp.isfinite(out)))
    print("KERNEL_OK")
</pallas_src>

<mosaic_0001>
module attributes {stable_mosaic.version = 11 : i64} {
  func.func @_cheb_embed_kernel(%arg0: memref<128x128xbf16, #tpu.memory_space<vmem>>, %arg1: memref<128x128xf32, #tpu.memory_space<vmem>>, %arg2: memref<5x128x128xf32, #tpu.memory_space<vmem>>, %arg3: memref<1x128xf32, #tpu.memory_space<vmem>>, %arg4: memref<5x128x128xf32, #tpu.memory_space<vmem>>, %arg5: memref<1x128xf32, #tpu.memory_space<vmem>>, %arg6: memref<128x128xf32, #tpu.memory_space<vmem>>) attributes {dimension_semantics = [], scalar_prefetch = 0 : i64, scratch_operands = 0 : i64, tpu.core_type = #tpu.core_type<tc>} {
    %c0 = arith.constant 0 : index
    %c0_0 = arith.constant 0 : index
    %0 = vector.load %arg0[%c0, %c0_0] : memref<128x128xbf16, #tpu.memory_space<vmem>>, vector<128x128xbf16>
    %c0_1 = arith.constant 0 : index
    %c0_2 = arith.constant 0 : index
    %1 = vector.load %arg1[%c0_1, %c0_2] : memref<128x128xf32, #tpu.memory_space<vmem>>, vector<128x128xf32>
    %c0_3 = arith.constant 0 : index
    %c0_4 = arith.constant 0 : index
    %c0_5 = arith.constant 0 : index
    %2 = vector.load %arg2[%c0_3, %c0_4, %c0_5] : memref<5x128x128xf32, #tpu.memory_space<vmem>>, vector<1x128x128xf32>
    %3 = vector.shape_cast %2 : vector<1x128x128xf32> to vector<128x128xf32>
    %cst = arith.constant dense<0.000000e+00> : vector<128x128xf32>
    %4 = tpu.matmul %1, %3, %cst {dimension_numbers = #tpu.dot_dimension_numbers<[1], [0], [0], [1], [0, 0, 1, 1], [], []>} : vector<128x128xf32>, vector<128x128xf32>, vector<128x128xf32> -> vector<128x128xf32>
    %5 = arith.truncf %1 : vector<128x128xf32> to vector<128x128xbf16>
    %cst_6 = arith.constant dense<0.000000e+00> : vector<128x128xf32>
    %6 = tpu.matmul %0, %5, %cst_6 {dimension_numbers = #tpu.dot_dimension_numbers<[1], [0], [0], [1], [0, 0, 1, 1], [], []>} : vector<128x128xbf16>, vector<128x128xbf16>, vector<128x128xf32> -> vector<128x128xf32>
    %c1 = arith.constant 1 : index
    %c0_7 = arith.constant 0 : index
    %c0_8 = arith.constant 0 : index
    %7 = vector.load %arg2[%c1, %c0_7, %c0_8] : memref<5x128x128xf32, #tpu.memory_space<vmem>>, vector<1x128x128xf32>
    %8 = vector.shape_cast %7 : vector<1x128x128xf32> to vector<128x128xf32>
    %cst_9 = arith.constant dense<0.000000e+00> : vector<128x128xf32>
    %9 = tpu.matmul %6, %8, %cst_9 {dimension_numbers = #tpu.dot_dimension_numbers<[1], [0], [0], [1], [0, 0, 1, 1], [], []>} : vector<128x128xf32>, vector<128x128xf32>, vector<128x128xf32> -> vector<128x128xf32>
    %10 = arith.addf %4, %9 : vector<128x128xf32>
    %11 = arith.truncf %6 : vector<128x128xf32> to vector<128x128xbf16>
    %cst_10 = arith.constant dense<0.000000e+00> : vector<128x128xf32>
    %12 = tpu.matmul %0, %11, %cst_10 {dimension_numbers = #tpu.dot_dimension_numbers<[1], [0], [0], [1], [0, 0, 1, 1], [], []>} : vector<128x128xbf16>, vector<128x128xbf16>, vector<128x128xf32> -> vector<128x128xf32>
    %cst_11 = arith.constant 2.000000e+00 : f32
    %13 = vector.broadcast %cst_11 : f32 to vector<128x128xf32>
    %14 = arith.mulf %13, %12 : vector<128x128xf32>
    %15 = arith.subf %14, %1 : vector<128x128xf32>
    %c2 = arith.constant 2 : index
    %c0_12 = arith.constant 0 : index
    %c0_13 = arith.constant 0 : index
    %16 = vector.load %arg2[%c2, %c0_12, %c0_13] : memref<5x128x128xf32, #tpu.memory_space<vmem>>, vector<1x128x128xf32>
    %17 = vector.shape_cast %16 : vector<1x128x128xf32> to vector<128x128xf32>
    %cst_14 = arith.constant dense<0.000000e+00> : vector<128x128xf32>
    %18 = tpu.matmul %15, %17, %cst_14 {dimension_numbers = #tpu.dot_dimension_numbers<[1], [0], [0], [1], [0, 0, 1, 1], [], []>} : vector<128x128xf32>, vector<128x128xf32>, vector<128x128xf32> -> vector<128x128xf32>
    %19 = arith.addf %10, %18 : vector<128x128xf32>
    %20 = arith.truncf %15 : vector<128x128xf32> to vector<128x128xbf16>
    %cst_15 = arith.constant dense<0.000000e+00> : vector<128x128xf32>
    %21 = tpu.matmul %0, %20, %cst_15 {dimension_numbers = #tpu.dot_dimension_numbers<[1], [0], [0], [1], [0, 0, 1, 1], [], []>} : vector<128x128xbf16>, vector<128x128xbf16>, vector<128x128xf32> -> vector<128x128xf32>
    %cst_16 = arith.constant 2.000000e+00 : f32
    %22 = vector.broadcast %cst_16 : f32 to vector<128x128xf32>
    %23 = arith.mulf %22, %21 : vector<128x128xf32>
    %24 = arith.subf %23, %6 : vector<128x128xf32>
    %c3 = arith.constant 3 : index
    %c0_17 = arith.constant 0 : index
    %c0_18 = arith.constant 0 : index
    %25 = vector.load %arg2[%c3, %c0_17, %c0_18] : memref<5x128x128xf32, #tpu.memory_space<vmem>>, vector<1x128x128xf32>
    %26 = vector.shape_cast %25 : vector<1x128x128xf32> to vector<128x128xf32>
    %cst_19 = arith.constant dense<0.000000e+00> : vector<128x128xf32>
    %27 = tpu.matmul %24, %26, %cst_19 {dimension_numbers = #tpu.dot_dimension_numbers<[1], [0], [0], [1], [0, 0, 1, 1], [], []>} : vector<128x128xf32>, vector<128x128xf32>, vector<128x128xf32> -> vector<128x128xf32>
    %28 = arith.addf %19, %27 : vector<128x128xf32>
    %29 = arith.truncf %24 : vector<128x128xf32> to vector<128x128xbf16>
    %cst_20 = arith.constant dense<0.000000e+00> : vector<128x128xf32>
    %30 = tpu.matmul %0, %29, %cst_20 {dimension_numbers = #tpu.dot_dimension_numbers<[1], [0], [0], [1], [0, 0, 1, 1], [], []>} : vector<128x128xbf16>, vector<128x128xbf16>, vector<128x128xf32> -> vector<128x128xf32>
    %cst_21 = arith.constant 2.000000e+00 : f32
    %31 = vector.broadcast %cst_21 : f32 to vector<128x128xf32>
    %32 = arith.mulf %31, %30 : vector<128x128xf32>
    %33 = arith.subf %32, %15 : vector<128x128xf32>
    %c4 = arith.constant 4 : index
    %c0_22 = arith.constant 0 : index
    %c0_23 = arith.constant 0 : index
    %34 = vector.load %arg2[%c4, %c0_22, %c0_23] : memref<5x128x128xf32, #tpu.memory_space<vmem>>, vector<1x128x128xf32>
    %35 = vector.shape_cast %34 : vector<1x128x128xf32> to vector<128x128xf32>
    %cst_24 = arith.constant dense<0.000000e+00> : vector<128x128xf32>
    %36 = tpu.matmul %33, %35, %cst_24 {dimension_numbers = #tpu.dot_dimension_numbers<[1], [0], [0], [1], [0, 0, 1, 1], [], []>} : vector<128x128xf32>, vector<128x128xf32>, vector<128x128xf32> -> vector<128x128xf32>
    %37 = arith.addf %28, %36 : vector<128x128xf32>
    %c0_25 = arith.constant 0 : index
    %c0_26 = arith.constant 0 : index
    %38 = vector.load %arg3[%c0_25, %c0_26] : memref<1x128xf32, #tpu.memory_space<vmem>>, vector<1x128xf32>
    %39 = vector.broadcast %38 : vector<1x128xf32> to vector<128x128xf32>
    %40 = arith.addf %37, %39 : vector<128x128xf32>
    %cst_27 = arith.constant 0.000000e+00 : f32
    %41 = vector.broadcast %cst_27 : f32 to vector<128x128xf32>
    %42 = arith.maximumf %40, %41 : vector<128x128xf32>
    %c0_28 = arith.constant 0 : index
    %c0_29 = arith.constant 0 : index
    %c0_30 = arith.constant 0 : index
    %43 = vector.load %arg4[%c0_28, %c0_29, %c0_30] : memref<5x128x128xf32, #tpu.memory_space<vmem>>, vector<1x128x128xf32>
    %44 = vector.shape_cast %43 : vector<1x128x128xf32> to vector<128x128xf32>
    %cst_31 = arith.constant dense<0.000000e+00> : vector<128x128xf32>
    %45 = tpu.matmul %42, %44, %cst_31 {dimension_numbers = #tpu.dot_dimension_numbers<[1], [0], [0], [1], [0, 0, 1, 1], [], []>} : vector<128x128xf32>, vector<128x128xf32>, vector<128x128xf32> -> vector<128x128xf32>
    %46 = arith.truncf %42 : vector<128x128xf32> to vector<128x128xbf16>
    %cst_32 = arith.constant dense<0.000000e+00> : vector<128x128xf32>
    %47 = tpu.matmul %0, %46, %cst_32 {dimension_numbers = #tpu.dot_dimension_numbers<[1], [0], [0], [1], [0, 0, 1, 1], [], []>} : vector<128x128xbf16>, vector<128x128xbf16>, vector<128x128xf32> -> vector<128x128xf32>
    %c1_33 = arith.constant 1 : index
    %c0_34 = arith.constant 0 : index
    %c0_35 = arith.constant 0 : index
    %48 = vector.load %arg4[%c1_33, %c0_34, %c0_35] : memref<5x128x128xf32, #tpu.memory_space<vmem>>, vector<1x128x128xf32>
    %49 = vector.shape_cast %48 : vector<1x128x128xf32> to vector<128x128xf32>
    %cst_36 = arith.constant dense<0.000000e+00> : vector<128x128xf32>
    %50 = tpu.matmul %47, %49, %cst_36 {dimension_numbers = #tpu.dot_dimension_numbers<[1], [0], [0], [1], [0, 0, 1, 1], [], []>} : vector<128x128xf32>, vector<128x128xf32>, vector<128x128xf32> -> vector<128x128xf32>
    %51 = arith.addf %45, %50 : vector<128x128xf32>
    %52 = arith.truncf %47 : vector<128x128xf32> to vector<128x128xbf16>
    %cst_37 = arith.constant dense<0.000000e+00> : vector<128x128xf32>
    %53 = tpu.matmul %0, %52, %cst_37 {dimension_numbers = #tpu.dot_dimension_numbers<[1], [0], [0], [1], [0, 0, 1, 1], [], []>} : vector<128x128xbf16>, vector<128x128xbf16>, vector<128x128xf32> -> vector<128x128xf32>
    %cst_38 = arith.constant 2.000000e+00 : f32
    %54 = vector.broadcast %cst_38 : f32 to vector<128x128xf32>
    %55 = arith.mulf %54, %53 : vector<128x128xf32>
    %56 = arith.subf %55, %42 : vector<128x128xf32>
    %c2_39 = arith.constant 2 : index
    %c0_40 = arith.constant 0 : index
    %c0_41 = arith.constant 0 : index
    %57 = vector.load %arg4[%c2_39, %c0_40, %c0_41] : memref<5x128x128xf32, #tpu.memory_space<vmem>>, vector<1x128x128xf32>
    %58 = vector.shape_cast %57 : vector<1x128x128xf32> to vector<128x128xf32>
    %cst_42 = arith.constant dense<0.000000e+00> : vector<128x128xf32>
    %59 = tpu.matmul %56, %58, %cst_42 {dimension_numbers = #tpu.dot_dimension_numbers<[1], [0], [0], [1], [0, 0, 1, 1], [], []>} : vector<128x128xf32>, vector<128x128xf32>, vector<128x128xf32> -> vector<128x128xf32>
    %60 = arith.addf %51, %59 : vector<128x128xf32>
    %61 = arith.truncf %56 : vector<128x128xf32> to vector<128x128xbf16>
    %cst_43 = arith.constant dense<0.000000e+00> : vector<128x128xf32>
    %62 = tpu.matmul %0, %61, %cst_43 {dimension_numbers = #tpu.dot_dimension_numbers<[1], [0], [0], [1], [0, 0, 1, 1], [], []>} : vector<128x128xbf16>, vector<128x128xbf16>, vector<128x128xf32> -> vector<128x128xf32>
    %cst_44 = arith.constant 2.000000e+00 : f32
    %63 = vector.broadcast %cst_44 : f32 to vector<128x128xf32>
    %64 = arith.mulf %63, %62 : vector<128x128xf32>
    %65 = arith.subf %64, %47 : vector<128x128xf32>
    %c3_45 = arith.constant 3 : index
    %c0_46 = arith.constant 0 : index
    %c0_47 = arith.constant 0 : index
    %66 = vector.load %arg4[%c3_45, %c0_46, %c0_47] : memref<5x128x128xf32, #tpu.memory_space<vmem>>, vector<1x128x128xf32>
    %67 = vector.shape_cast %66 : vector<1x128x128xf32> to vector<128x128xf32>
    %cst_48 = arith.constant dense<0.000000e+00> : vector<128x128xf32>
    %68 = tpu.matmul %65, %67, %cst_48 {dimension_numbers = #tpu.dot_dimension_numbers<[1], [0], [0], [1], [0, 0, 1, 1], [], []>} : vector<128x128xf32>, vector<128x128xf32>, vector<128x128xf32> -> vector<128x128xf32>
    %69 = arith.addf %60, %68 : vector<128x128xf32>
    %70 = arith.truncf %65 : vector<128x128xf32> to vector<128x128xbf16>
    %cst_49 = arith.constant dense<0.000000e+00> : vector<128x128xf32>
    %71 = tpu.matmul %0, %70, %cst_49 {dimension_numbers = #tpu.dot_dimension_numbers<[1], [0], [0], [1], [0, 0, 1, 1], [], []>} : vector<128x128xbf16>, vector<128x128xbf16>, vector<128x128xf32> -> vector<128x128xf32>
    %cst_50 = arith.constant 2.000000e+00 : f32
    %72 = vector.broadcast %cst_50 : f32 to vector<128x128xf32>
    %73 = arith.mulf %72, %71 : vector<128x128xf32>
    %74 = arith.subf %73, %56 : vector<128x128xf32>
    %c4_51 = arith.constant 4 : index
    %c0_52 = arith.constant 0 : index
    %c0_53 = arith.constant 0 : index
    %75 = vector.load %arg4[%c4_51, %c0_52, %c0_53] : memref<5x128x128xf32, #tpu.memory_space<vmem>>, vector<1x128x128xf32>
    %76 = vector.shape_cast %75 : vector<1x128x128xf32> to vector<128x128xf32>
    %cst_54 = arith.constant dense<0.000000e+00> : vector<128x128xf32>
    %77 = tpu.matmul %74, %76, %cst_54 {dimension_numbers = #tpu.dot_dimension_numbers<[1], [0], [0], [1], [0, 0, 1, 1], [], []>} : vector<128x128xf32>, vector<128x128xf32>, vector<128x128xf32> -> vector<128x128xf32>
    %78 = arith.addf %69, %77 : vector<128x128xf32>
    %c0_55 = arith.constant 0 : index
    %c0_56 = arith.constant 0 : index
    %79 = vector.load %arg5[%c0_55, %c0_56] : memref<1x128xf32, #tpu.memory_space<vmem>>, vector<1x128xf32>
    %80 = vector.broadcast %79 : vector<1x128xf32> to vector<128x128xf32>
    %81 = arith.addf %78, %80 : vector<128x128xf32>
    %cst_57 = arith.constant 0.000000e+00 : f32
    %82 = vector.broadcast %cst_57 : f32 to vector<128x128xf32>
    %83 = arith.maximumf %81, %82 : vector<128x128xf32>
    %c0_58 = arith.constant 0 : index
    %c0_59 = arith.constant 0 : index
    %84 = vector.load %arg6[%c0_58, %c0_59] : memref<128x128xf32, #tpu.memory_space<vmem>>, vector<128x128xf32>
    tpu.vector_store %arg6[%c0_58, %c0_59], %83 {strides = array<i32>} : memref<128x128xf32, #tpu.memory_space<vmem>>, vector<128x128xf32>,
    return
  }
}

</mosaic_0001>

<bundles_post_ra>
// kernel: tpu_custom_call.1
= control target key start
LH: loop header
LB: loop body
LE: loop exit
PB: predicated region body
PF: predicated region fallthrough
CT: control target
= control target key end

     0   :  { %11 = vsyncpa [#allocation3], 0  ;;  %s5607_s0 = inlined_call_operand.hbm [shape: bf16[128,128], index: 0, kind: input, shape index: {}]   ;;  %s5608_s1 = inlined_call_operand.hbm [shape: f32[128,128], index: 1, kind: input, shape index: {}]   ;;  %s5609_s2 = inlined_call_operand.hbm [shape: f32[5,128,128], index: 2, kind: input, shape index: {}]   ;;  %s5610_s3 = inlined_call_operand.vmem [shape: f32[1,128], index: 3, kind: input, shape index: {}]   ;;  %s5611_s4 = inlined_call_operand.hbm [shape: f32[5,128,128], index: 4, kind: input, shape index: {}]   ;;  %s5612_s5 = inlined_call_operand.vmem [shape: f32[1,128], index: 5, kind: input, shape index: {}]   ;;  %s5613_s6 = inlined_call_operand.hbm [shape: f32[128,128], index: 6, kind: output, shape index: {}]  }
   0x1   :  { %12 = vsyncpa [#allocation6], 0 }
   0x2   :  { %13 = vsyncpa [#allocation9], 0 }
   0x3   :  { %14 = vsyncpa [#allocation4], 0  ;;  %s4884_s21 = smov [#allocation5]   ;;  %s4766_s25 = scalar_lea.hbm %s5608_s1, 2048 }
   0x4   :  { %s32_s22 = sshll.u32 %s4884_s21, 4  ;;  %p4767_p0 = scmp.ne.s32.totalorder %s5608_s1, %s4766_s25  ;;  %s33_s22 = int_to_ptr.vmem [resolvable:$true] %s32_s22 }
   0x5   :  { %p4770_p1 = scmp.lt.u32.totalorder %s4766_s25, %s5608_s1 }
   0x7   :  { %p4772_p2 = pnand %p4770_p1, %p4767_p0 }
   0x9   :  { %4775 = shalt.err (!%p4772_p2)
}
   0xa   :  { %s4776_s30 = scalar_lea.vmem %s33_s22, 2048  ;;  %p4781_p4 = scmp.lt.s32.totalorder %s33_s22, %s33_s22 }
   0xb   :  { %p4777_p3 = scmp.ne.s32.totalorder %s33_s22, %s4776_s30  ;;  %p4782_p5 = scmp.lt.s32.totalorder %s4776_s30, %s4776_s30 }
   0xd   :  { %p4783_p6 = por %p4782_p5, %p4781_p4 }
   0xf   :  { %p4784_p7 = pnand %p4783_p6, %p4777_p3 }
  0x11   :  { %4787 = shalt.err (!%p4784_p7)
}
  0x12   :  { %s4885_s7 = smov 128   ;;  %s4886_s8 = smov 8  }
  0x13   :  { %38 = dma.hbm_to_vmem [thread:$0]  %s5608_s1, 2048, %s33_s22, [#allocation6], %s4885_s7, %s4885_s7, %s4886_s8  }
  0x14   :  { %s4887_s11 = smov [#allocation2]   ;;  %s4788_s15 = scalar_lea.hbm %s5607_s0, 1024 }
  0x15   :  { %s20_s12 = sshll.u32 %s4887_s11, 4  ;;  %p4789_p8 = scmp.ne.s32.totalorder %s5607_s0, %s4788_s15  ;;  %s21_s12 = int_to_ptr.vmem [resolvable:$true] %s20_s12 }
  0x16   :  { %p4792_p9 = scmp.lt.u32.totalorder %s4788_s15, %s5607_s0 }
  0x18   :  { %p4794_p10 = pnand %p4792_p9, %p4789_p8 }
  0x1a   :  { %4797 = shalt.err (!%p4794_p10)
}
  0x1b   :  { %s4798_s20 = scalar_lea.vmem %s21_s12, 1024  ;;  %p4803_p12 = scmp.lt.s32.totalorder %s21_s12, %s21_s12 }
  0x1c   :  { %p4799_p11 = scmp.ne.s32.totalorder %s21_s12, %s4798_s20  ;;  %p4804_p13 = scmp.lt.s32.totalorder %s4798_s20, %s4798_s20 }
  0x1e   :  { %p4805_p0 = por %p4804_p13, %p4803_p12 }
  0x20   :  { %p4806_p1 = pnand %p4805_p0, %p4799_p11 }
  0x22   :  { %4809 = shalt.err (!%p4806_p1)
}
  0x23   :  { %s4888_s1 = smov 64   ;;  %s4889_s21 = smov 4  }
  0x24   :  { %26 = dma.hbm_to_vmem [thread:$0]  %s5607_s0, 1024, %s21_s12, [#allocation3], %s4888_s1, %s4888_s1, %s4889_s21  }
  0x25   :  { %s4890_s24 = smov [#allocation7]   ;;  %s4891_s26 = smov [#allocation8]  }
  0x26   :  { %s44_s25 = sshll.u32 %s4890_s24, 4  ;;  %s58_s27 = sshll.u32 %s4891_s26, 4  ;;  %s45_s25 = int_to_ptr.vmem [resolvable:$true] %s44_s25  ;;  %s4955_s27 = int_to_ptr.vmem [resolvable:$true] %s58_s27 }
  0x27   :  { %s4810_s30 = scalar_lea.hbm %s5609_s2, 10240 }
  0x28   :  { %p4811_p2 = scmp.ne.s32.totalorder %s5609_s2, %s4810_s30  ;;  %p4814_p3 = scmp.lt.u32.totalorder %s4810_s30, %s5609_s2 }
  0x2a   :  { %p4816_p4 = pnand %p4814_p3, %p4811_p2 }
  0x2c   :  { %4819 = shalt.err (!%p4816_p4)
}
  0x2d   :  { %s4820_s0 = scalar_lea.vmem %s45_s25, 10240  ;;  %p4825_p6 = scmp.lt.s32.totalorder %s45_s25, %s45_s25 }
  0x2e   :  { %p4821_p5 = scmp.ne.s32.totalorder %s45_s25, %s4820_s0  ;;  %p4826_p7 = scmp.lt.s32.totalorder %s4820_s0, %s4820_s0 }
  0x30   :  { %p4827_p8 = por %p4826_p7, %p4825_p6 }
  0x32   :  { %p4828_p9 = pnand %p4827_p8, %p4821_p5 }
  0x34   :  { %4831 = shalt.err (!%p4828_p9)
}
  0x35   :  { %50 = dma.hbm_to_vmem [thread:$0]  %s5609_s2, 10240, %s45_s25, [#allocation6], %s4885_s7, %s4885_s7, %s4886_s8  }
  0x36   :  { %s4832_s17 = scalar_lea.hbm %s5611_s4, 10240 }
  0x37   :  { %p4833_p10 = scmp.ne.s32.totalorder %s5611_s4, %s4832_s17  ;;  %p4836_p11 = scmp.lt.u32.totalorder %s4832_s17, %s5611_s4 }
  0x39   :  { %p4838_p12 = pnand %p4836_p11, %p4833_p10 }
  0x3b   :  { %4841 = shalt.err (!%p4838_p12)
}
  0x3c   :  { %s4842_s21 = scalar_lea.vmem %s4955_s27, 10240  ;;  %p4847_p0 = scmp.lt.s32.totalorder %s4955_s27, %s4955_s27 }
  0x3d   :  { %p4843_p13 = scmp.ne.s32.totalorder %s4955_s27, %s4842_s21  ;;  %p4848_p1 = scmp.lt.s32.totalorder %s4842_s21, %s4842_s21 }
  0x3f   :  { %p4849_p2 = por %p4848_p1, %p4847_p0 }
  0x41   :  { %p4850_p3 = pnand %p4849_p2, %p4843_p13 }
  0x43   :  { %4853 = shalt.err (!%p4850_p3)
}
  0x44   :  { %64 = dma.hbm_to_vmem [thread:$0]  %s5611_s4, 10240, %s4955_s27, [#allocation9], %s4885_s7, %s4885_s7, %s4886_s8  }
  0x45   :  { %4876 = dma.done.wait [#allocation3], 1024  }
  0x46   :  { %4877 = vsyncadd [#allocation3], 4294966272 }
  0x47   :  { %4878 = dma.done.wait [#allocation6], 12288  }
  0x48   :  { %4879 = vsyncadd [#allocation6], 4294955008 }
  0x49   :  { %4880 = dma.done.wait [#allocation9], 10240  }
  0x4a   :  { %4881 = vsyncadd [#allocation9], 4294957056  ;;  %v4992_v0 = vld [vmem:[#allocation5] sm:$0xff]  ;;  %v4994_v1 = vld [vmem:[#allocation5 + $0x8] sm:$0xff] }
  0x4b   :  { %v4996_v2 = vld [vmem:[#allocation5 + $0x10] sm:$0xff]  ;;  %v128_v3 = vpack.c.bf16 %v4994_v1, %v4992_v0  ;;  %v5000_v4 = vld [vmem:[#allocation5 + $0x18] sm:$0xff]  ;;  %v5004_v6 = vld [vmem:[#allocation5 + $0x20] sm:$0xff] }
  0x4c   :  { %v129_v5 = vpack.c.bf16 %v5000_v4, %v4996_v2  ;;  %v5006_v7 = vld [vmem:[#allocation5 + $0x28] sm:$0xff]  ;;  %v5008_v8 = vld [vmem:[#allocation5 + $0x30] sm:$0xff]  ;;  %v5012_v10 = vld [vmem:[#allocation5 + $0x38] sm:$0xff] }
  0x4d   :  { %3477 = vmatprep.subr.bf16.mxu1 %v128_v3  ;;  %v130_v9 = vpack.c.bf16 %v5006_v7, %v5004_v6  ;;  %v5014_v11 = vld [vmem:[#allocation2] sm:$0xff]   ;;  %v131_v12 = vpack.c.bf16 %v5012_v10, %v5008_v8  ;;  %v5022_v14 = vld [vmem:[#allocation5 + $0x48] sm:$0xff]  ;;  %v5026_v16 = vld [vmem:[#allocation5 + $0x50] sm:$0xff] }
  0x4e   :  { %3478 = vmatpush3.bf16.msra.mxu1 %v128_v3  ;;  %3493 = vmatprep.mubr.bf16.mxu1 %v5014_v11  ;;  %v5019_v13 = vld [vmem:[#allocation5 + $0x40] sm:$0xff]  ;;  %v5028_v17 = vld [vmem:[#allocation5 + $0x58] sm:$0xff]  ;;  %v5034_v20 = vld [vmem:[#allocation5 + $0x68] sm:$0xff] }
  0x4f   :  { %3479 = vmatprep.subr.bf16.mxu1 %v129_v5  ;;  %3637 = vmatprep.mubr.bf16.mxu0 %v5014_v11  ;;  %v132_v15 = vpack.c.bf16 %v5022_v14, %v5019_v13  ;;  %v133_v18 = vpack.c.bf16 %v5028_v17, %v5026_v16  ;;  %v5032_v19 = vld [vmem:[#allocation5 + $0x60] sm:$0xff]  ;;  %v5038_v22 = vld [vmem:[#allocation5 + $0x70] sm:$0xff]  ;;  %v5040_v23 = vld [vmem:[#allocation5 + $0x78] sm:$0xff] }
  0x50   :  { %v134_v21 = vpack.c.bf16 %v5034_v20, %v5032_v19  ;;  %v135_v24 = vpack.c.bf16 %v5040_v23, %v5038_v22  ;;  %v282_v25 = vld [vmem:[#allocation7 + $0x80] sm:$0xff]  ;;  %v283_v26 = vld [vmem:[#allocation7 + $0x88] sm:$0xff]  ;;  %v284_v28 = vld [vmem:[#allocation7 + $0x90] sm:$0xff] }
  0x51   :  { %v4293_v27 = vpack.c.bf16 %v283_v26, %v282_v25  ;;  %v285_v29 = vld [vmem:[#allocation7 + $0x98] sm:$0xff]  ;;  %v5044_v30 = vld [vmem:[#allocation2 + $0x8] sm:$0xff]   ;;  %v5046_v31 = vld [vmem:[#allocation2 + $0x10] sm:$0xff]  }
  0x52   :  { %3480 = vmatpush3.bf16.msra.mxu1 %v129_v5  ;;  %v4297_v32 = vpack.c.bf16 %v285_v29, %v284_v28  ;;  %v286_v33 = vld [vmem:[#allocation7 + $0xa0] sm:$0xff]  ;;  %v287_v34 = vld [vmem:[#allocation7 + $0xa8] sm:$0xff]  ;;  %v288_v36 = vld [vmem:[#allocation7 + $0xb0] sm:$0xff] }
  0x53   :  { %3481 = vmatprep.subr.bf16.mxu1 %v130_v9  ;;  %v4301_v35 = vpack.c.bf16 %v287_v34, %v286_v33  ;;  %v289_v37 = vld [vmem:[#allocation7 + $0xb8] sm:$0xff]  ;;  %v5052_v39 = vld [vmem:[#allocation2 + $0x20] sm:$0xff]   ;;  %v291_v42 = vld [vmem:[#allocation7 + $0xc8] sm:$0xff] }
  0x54   :  { %v5050_v38 = vld [vmem:[#allocation2 + $0x18] sm:$0xff]   ;;  %v4305_v40 = vpack.c.bf16 %v289_v37, %v288_v36  ;;  %v290_v41 = vld [vmem:[#allocation7 + $0xc0] sm:$0xff]  ;;  %v292_v44 = vld [vmem:[#allocation7 + $0xd0] sm:$0xff] }
  0x55   :  { %v4309_v43 = vpack.c.bf16 %v291_v42, %v290_v41  ;;  %v293_v45 = vld [vmem:[#allocation7 + $0xd8] sm:$0xff]  ;;  %v5056_v46 = vld [vmem:[#allocation2 + $0x28] sm:$0xff]   ;;  %v5058_v47 = vld [vmem:[#allocation2 + $0x30] sm:$0xff]  }
  0x56   :  { %3482 = vmatpush3.bf16.msra.mxu1 %v130_v9  ;;  %v4313_v48 = vpack.c.bf16 %v293_v45, %v292_v44  ;;  %v294_v49 = vld [vmem:[#allocation7 + $0xe0] sm:$0xff]  ;;  %v295_v50 = vld [vmem:[#allocation7 + $0xe8] sm:$0xff]  ;;  %v5062_v52 = vld [vmem:[#allocation2 + $0x38] sm:$0xff]  }
  0x57   :  { %3483 = vmatprep.subr.bf16.mxu1 %v131_v12  ;;  %v4317_v51 = vpack.c.bf16 %v295_v50, %v294_v49  ;;  %v296_v53 = vld [vmem:[#allocation7 + $0xf0] sm:$0xff]  ;;  %v297_v54 = vld [vmem:[#allocation7 + $0xf8] sm:$0xff]  ;;  %v112_v56 = vld [vmem:[#allocation7] sm:$0xff] }
  0x58   :  { %v4321_v55 = vpack.c.bf16 %v297_v54, %v296_v53  ;;  %v113_v57 = vld [vmem:[#allocation7 + $0x8] sm:$0xff]  ;;  %v114_v59 = vld [vmem:[#allocation7 + $0x10] sm:$0xff]  ;;  %v115_v60 = vld [vmem:[#allocation7 + $0x18] sm:$0xff] }
  0x59   :  { %v4325_v58 = vpack.c.bf16 %v113_v57, %v112_v56  ;;  %v4329_v3 = vpack.c.bf16 %v115_v60, %v114_v59  ;;  %v119_v25 = vld [vmem:[#allocation7 + $0x38] sm:$0xff]  ;;  %v120_v34 = vld [vmem:[#allocation7 + $0x40] sm:$0xff] }
  0x5a   :  { %3484 = vmatpush3.bf16.msra.mxu1 %v131_v12  ;;  %v116_v12 = vld [vmem:[#allocation7 + $0x20] sm:$0xff]  ;;  %v123_v41 = vld [vmem:[#allocation7 + $0x58] sm:$0xff] }
  0x5b   :  { %3485 = vmatprep.subr.bf16.mxu1 %v132_v15  ;;  %v124_v50 = vld [vmem:[#allocation7 + $0x60] sm:$0xff]  ;;  %v127_v56 = vld [vmem:[#allocation7 + $0x78] sm:$0xff] }
  0x5e   :  { %3486 = vmatpush3.bf16.msra.mxu1 %v132_v15  ;;  %v117_v15 = vld [vmem:[#allocation7 + $0x28] sm:$0xff] }
  0x5f   :  { %3487 = vmatprep.subr.bf16.mxu1 %v133_v18 }
  0x62   :  { %3488 = vmatpush3.bf16.msra.mxu1 %v133_v18 }
  0x63   :  { %3489 = vmatprep.subr.bf16.mxu1 %v134_v21 }
  0x66   :  { %3490 = vmatpush3.bf16.msra.mxu1 %v134_v21  ;;  %v4333_v21 = vpack.c.bf16 %v117_v15, %v116_v12  ;;  %v726_v12 = vld [vmem:[#allocation7 + $0x100] sm:$0xff]  ;;  %v727_v15 = vld [vmem:[#allocation7 + $0x108] sm:$0xff] }
  0x67   :  { %3491 = vmatprep.subr.bf16.mxu1 %v135_v24 }
  0x6a   :  { %3492 = vmatpush3.bf16.msra.mxu1 %v135_v24  ;;  %v118_v24 = vld [vmem:[#allocation7 + $0x30] sm:$0xff] }
  0x6b   :  { %4294 = vmatprep.subr.bf16.mxu1 %v4293_v27  ;;  %v4337_v29 = vpack.c.bf16 %v119_v25, %v118_v24  ;;  %v728_v24 = vld [vmem:[#allocation7 + $0x110] sm:$0xff]  ;;  %v729_v25 = vld [vmem:[#allocation7 + $0x118] sm:$0xff] }
  0x6d   :  { %3494 = vmatmul.mubr.bf16.vlgmr.msra.gmra.mrb[0].mxu1 %v5044_v30 }
  0x6e   :  { %3497 = vmatprep.mubr.bf16.mxu1 %v5046_v31  ;;  %4296 = vmatpush3.bf16.msra.mxu1 %v4293_v27 }
  0x6f   :  { %4298 = vmatprep.subr.bf16.mxu1 %v4297_v32 }
  0x72   :  { %4300 = vmatpush3.bf16.msra.mxu1 %v4297_v32 }
  0x73   :  { %4302 = vmatprep.subr.bf16.mxu1 %v4301_v35 }
  0x75   :  { %3498 = vmatmul.mubr.bf16.gmra.mrb[4].mxu1 %v5050_v38 }
  0x76   :  { %3501 = vmatprep.mubr.bf16.mxu1 %v5052_v39  ;;  %4304 = vmatpush3.bf16.msra.mxu1 %v4301_v35  ;;  %v121_v35 = vld [vmem:[#allocation7 + $0x48] sm:$0xff] }
  0x77   :  { %4306 = vmatprep.subr.bf16.mxu1 %v4305_v40  ;;  %v4341_v37 = vpack.c.bf16 %v121_v35, %v120_v34  ;;  %v731_v34 = vld [vmem:[#allocation7 + $0x128] sm:$0xff] }
  0x7a   :  { %4308 = vmatpush3.bf16.msra.mxu1 %v4305_v40  ;;  %v122_v40 = vld [vmem:[#allocation7 + $0x50] sm:$0xff] }
  0x7b   :  { %4310 = vmatprep.subr.bf16.mxu1 %v4309_v43  ;;  %v4345_v45 = vpack.c.bf16 %v123_v41, %v122_v40  ;;  %v734_v41 = vld [vmem:[#allocation7 + $0x140] sm:$0xff] }
  0x7d   :  { %3502 = vmatmul.mubr.bf16.gmra.mrb[8].mxu1 %v5056_v46 }
  0x7e   :  { %3505 = vmatprep.mubr.bf16.mxu1 %v5058_v47  ;;  %4312 = vmatpush3.bf16.msra.mxu1 %v4309_v43 }
  0x7f   :  { %4314 = vmatprep.subr.bf16.mxu1 %v4313_v48 }
  0x82   :  { %4316 = vmatpush3.bf16.msra.mxu1 %v4313_v48 }
  0x83   :  { %4318 = vmatprep.subr.bf16.mxu1 %v4317_v51 }
  0x85   :  { %3506 = vmatmul.mubr.bf16.gmra.mrb[12].mxu1 %v5062_v52 }
  0x86   :  { %4320 = vmatpush3.bf16.msra.mxu1 %v4317_v51  ;;  %v125_v51 = vld [vmem:[#allocation7 + $0x68] sm:$0xff] }
  0x87   :  { %4322 = vmatprep.subr.bf16.mxu1 %v4321_v55  ;;  %v4349_v54 = vpack.c.bf16 %v125_v51, %v124_v50  ;;  %v736_v50 = vld [vmem:[#allocation7 + $0x150] sm:$0xff]  ;;  %v737_v51 = vld [vmem:[#allocation7 + $0x158] sm:$0xff] }
  0x8a   :  { %4324 = vmatpush3.bf16.msra.mxu1 %v4321_v55  ;;  %v126_v55 = vld [vmem:[#allocation7 + $0x70] sm:$0xff] }
  0x8b   :  { %4326 = vmatprep.subr.bf16.mxu1 %v4325_v58  ;;  %v4353_v60 = vpack.c.bf16 %v127_v56, %v126_v55  ;;  %v739_v55 = vld [vmem:[#allocation7 + $0x168] sm:$0xff] }
 0x140   :  { %v5065_v61 = vpop.f32.mrb[0].mxu1 }
 0x141   :  { %v5067_v62 = vpop.f32.mrb[1].mxu1 }
 0x142   :  { %v5069_v63 = vpop.f32.mrb[2].mxu1  ;;  %3541 = vmatprep.mubr.f32.mxu1 %v5067_v62 }
 0x143   :  { %v589_v5 = vpack.c.bf16 %v5069_v63, %v5065_v61  ;;  %v5074_v9 = vpop.f32.mrb[3].mxu1 }
 0x144   :  { %3542 = vmatmul.mubr.f32.vlgmr.msra.gmra.mrb[16].mxu1 %v5074_v9  ;;  %v588_v18 = vpack.c.bf16 %v5074_v9, %v5067_v62 }
 0x145   :  { %3544 = vmatprep.mubr.f32.mxu1 %v5065_v61  ;;  %4328 = vmatpush3.bf16.msra.mxu1 %v4325_v58 }
 0x146   :  { %3621 = vmatprep.subr.bf16.mxu0 %v588_v18  ;;  %4330 = vmatprep.subr.bf16.mxu1 %v4329_v3 }
 0x147   :  { %3622 = vmatpush3.bf16.msra.mxu0 %v588_v18 }
 0x148   :  { %v5080_v26 = vpop.f32.mrb[4].mxu1  ;;  %3545 = vmatmul.mubr.f32.gmra.mrb[18].mxu1 %v5069_v63  ;;  %3623 = vmatprep.subr.bf16.mxu0 %v589_v5 }
 0x149   :  { %v5083_v27 = vpop.f32.mrb[5].mxu1  ;;  %4332 = vmatpush3.bf16.msra.mxu1 %v4329_v3 }
 0x14a   :  { %v5085_v28 = vpop.f32.mrb[6].mxu1  ;;  %3547 = vmatprep.mubr.f32.mxu1 %v5083_v27  ;;  %4334 = vmatprep.subr.bf16.mxu1 %v4333_v21 }
 0x14b   :  { %v591_v32 = vpack.c.bf16 %v5085_v28, %v5080_v26  ;;  %v5090_v33 = vpop.f32.mrb[7].mxu1  ;;  %3624 = vmatpush3.bf16.msra.mxu0 %v589_v5 }
 0x14c   :  { %v590_v36 = vpack.c.bf16 %v5090_v33, %v5083_v27  ;;  %3548 = vmatmul.mubr.f32.gmra.mrb[20].mxu1 %v5090_v33 }
 0x14d   :  { %3550 = vmatprep.mubr.f32.mxu1 %v5080_v26  ;;  %4336 = vmatpush3.bf16.msra.mxu1 %v4333_v21  ;;  %v4357_v21 = vpack.c.bf16 %v727_v15, %v726_v12  ;;  %v1041_v15 = vld [vmem:[#allocation7 + $0x180] sm:$0xff] }
 0x14e   :  { %3625 = vmatprep.subr.bf16.mxu0 %v590_v36  ;;  %4338 = vmatprep.subr.bf16.mxu1 %v4337_v29 }
 0x14f   :  { %3626 = vmatpush3.bf16.msra.mxu0 %v590_v36  ;;  %v732_v36 = vld [vmem:[#allocation7 + $0x130] sm:$0xff] }
 0x150   :  { %v5096_v42 = vpop.f32.mrb[8].mxu1  ;;  %3551 = vmatmul.mubr.f32.gmra.mrb[22].mxu1 %v5085_v28  ;;  %3627 = vmatprep.subr.bf16.mxu0 %v591_v32 }
 0x151   :  { %v5099_v43 = vpop.f32.mrb[9].mxu1  ;;  %4340 = vmatpush3.bf16.msra.mxu1 %v4337_v29  ;;  %v4361_v29 = vpack.c.bf16 %v729_v25, %v728_v24 }
 0x152   :  { %v5101_v44 = vpop.f32.mrb[10].mxu1  ;;  %3553 = vmatprep.mubr.f32.mxu1 %v5099_v43  ;;  %4342 = vmatprep.subr.bf16.mxu1 %v4341_v37 }
 0x153   :  { %v593_v48 = vpack.c.bf16 %v5101_v44, %v5096_v42  ;;  %v5106_v49 = vpop.f32.mrb[11].mxu1  ;;  %3628 = vmatpush3.bf16.msra.mxu0 %v591_v32  ;;  %v730_v32 = vld [vmem:[#allocation7 + $0x120] sm:$0xff] }
 0x154   :  { %v592_v53 = vpack.c.bf16 %v5106_v49, %v5099_v43  ;;  %3554 = vmatmul.mubr.f32.gmra.mrb[24].mxu1 %v5106_v49  ;;  %v4365_v35 = vpack.c.bf16 %v731_v34, %v730_v32 }
 0x155   :  { %3556 = vmatprep.mubr.f32.mxu1 %v5096_v42  ;;  %4344 = vmatpush3.bf16.msra.mxu1 %v4341_v37  ;;  %v733_v37 = vld [vmem:[#allocation7 + $0x138] sm:$0xff] }
 0x156   :  { %3629 = vmatprep.subr.bf16.mxu0 %v592_v53  ;;  %4346 = vmatprep.subr.bf16.mxu1 %v4345_v45  ;;  %v4369_v40 = vpack.c.bf16 %v733_v37, %v732_v36  ;;  %v1043_v37 = vld [vmem:[#allocation7 + $0x190] sm:$0xff] }
 0x157   :  { %3630 = vmatpush3.bf16.msra.mxu0 %v592_v53  ;;  %v4377_v53 = vpack.c.bf16 %v737_v51, %v736_v50 }
 0x158   :  { %v5112_v57 = vpop.f32.mrb[12].mxu1  ;;  %3557 = vmatmul.mubr.f32.gmra.mrb[26].mxu1 %v5101_v44  ;;  %3631 = vmatprep.subr.bf16.mxu0 %v593_v48 }
 0x159   :  { %v5115_v58 = vpop.f32.mrb[13].mxu1  ;;  %4348 = vmatpush3.bf16.msra.mxu1 %v4345_v45  ;;  %v735_v45 = vld [vmem:[#allocation7 + $0x148] sm:$0xff] }
 0x15a   :  { %v5117_v59 = vpop.f32.mrb[14].mxu1  ;;  %3559 = vmatprep.mubr.f32.mxu1 %v5115_v58  ;;  %4350 = vmatprep.subr.bf16.mxu1 %v4349_v54 }
 0x15b   :  { %v595_v3 = vpack.c.bf16 %v5117_v59, %v5112_v57  ;;  %v5122_v5 = vpop.f32.mrb[15].mxu1  ;;  %3632 = vmatpush3.bf16.msra.mxu0 %v593_v48  ;;  %v4373_v48 = vpack.c.bf16 %v735_v45, %v734_v41 }
 0x15c   :  { %v594_v18 = vpack.c.bf16 %v5122_v5, %v5115_v58  ;;  %3560 = vmatmul.mubr.f32.gmra.mrb[28].mxu1 %v5122_v5 }
 0x15d   :  { %3562 = vmatprep.mubr.f32.mxu1 %v5112_v57  ;;  %4352 = vmatpush3.bf16.msra.mxu1 %v4349_v54  ;;  %v738_v54 = vld [vmem:[#allocation7 + $0x160] sm:$0xff] }
 0x15e   :  { %3633 = vmatprep.subr.bf16.mxu0 %v594_v18  ;;  %4354 = vmatprep.subr.bf16.mxu1 %v4353_v60  ;;  %v4381_v56 = vpack.c.bf16 %v739_v55, %v738_v54  ;;  %v1045_v54 = vld [vmem:[#allocation7 + $0x1a0] sm:$0xff]  ;;  %v1046_v55 = vld [vmem:[#allocation7 + $0x1a8] sm:$0xff] }
 0x15f   :  { %3634 = vmatpush3.bf16.msra.mxu0 %v594_v18  ;;  %v1042_v18 = vld [vmem:[#allocation7 + $0x188] sm:$0xff] }
 0x160   :  { %3563 = vmatmul.mubr.f32.gmra.mrb[30].mxu1 %v5117_v59  ;;  %3635 = vmatprep.subr.bf16.mxu0 %v595_v3 }
 0x161   :  { %4356 = vmatpush3.bf16.msra.mxu1 %v4353_v60  ;;  %3597 = vmatprep.mubr.f32.mxu1 %v4992_v0  ;;  %v740_v60 = vld [vmem:[#allocation7 + $0x170] sm:$0xff] }
 0x162   :  { %4358 = vmatprep.subr.bf16.mxu1 %v4357_v21 }
 0x163   :  { %3636 = vmatpush3.bf16.msra.mxu0 %v595_v3  ;;  %v741_v3 = vld [vmem:[#allocation7 + $0x178] sm:$0xff] }
 0x164   :  { %3598 = vmatmul.mubr.f32.vlgmr.msra.gmra.mrb[16].mxu1 %v4994_v1  ;;  %v4385_v12 = vpack.c.bf16 %v741_v3, %v740_v60 }
 0x165   :  { %4360 = vmatpush3.bf16.msra.mxu1 %v4357_v21  ;;  %3600 = vmatprep.mubr.f32.mxu1 %v4996_v2  ;;  %v4389_v21 = vpack.c.bf16 %v1042_v18, %v1041_v15 }
 0x166   :  { %3638 = vmatmul.mubr.bf16.vlgmr.msra.gmra.mrb[0].mxu0 %v5044_v30  ;;  %4362 = vmatprep.subr.bf16.mxu1 %v4361_v29 }
 0x167   :  { %3641 = vmatprep.mubr.bf16.mxu0 %v5046_v31 }
 0x168   :  { %3601 = vmatmul.mubr.f32.gmra.mrb[18].mxu1 %v5000_v4 }
 0x169   :  { %4364 = vmatpush3.bf16.msra.mxu1 %v4361_v29  ;;  %3603 = vmatprep.mubr.f32.mxu1 %v5004_v6 }
 0x16a   :  { %4366 = vmatprep.subr.bf16.mxu1 %v4365_v35 }
 0x16c   :  { %3604 = vmatmul.mubr.f32.gmra.mrb[20].mxu1 %v5006_v7 }
 0x16d   :  { %4368 = vmatpush3.bf16.msra.mxu1 %v4365_v35  ;;  %3606 = vmatprep.mubr.f32.mxu1 %v5008_v8 }
 0x16e   :  { %3642 = vmatmul.mubr.bf16.gmra.mrb[4].mxu0 %v5050_v38  ;;  %4370 = vmatprep.subr.bf16.mxu1 %v4369_v40 }
 0x16f   :  { %3645 = vmatprep.mubr.bf16.mxu0 %v5052_v39 }
 0x170   :  { %3607 = vmatmul.mubr.f32.gmra.mrb[22].mxu1 %v5012_v10 }
 0x171   :  { %4372 = vmatpush3.bf16.msra.mxu1 %v4369_v40  ;;  %3609 = vmatprep.mubr.f32.mxu1 %v5019_v13  ;;  %v1044_v40 = vld [vmem:[#allocation7 + $0x198] sm:$0xff] }
 0x172   :  { %4374 = vmatprep.subr.bf16.mxu1 %v4373_v48  ;;  %v4393_v51 = vpack.c.bf16 %v1044_v40, %v1043_v37  ;;  %v1050_v37 = vld [vmem:[#allocation7 + $0x1c8] sm:$0xff] }
 0x174   :  { %3610 = vmatmul.mubr.f32.gmra.mrb[24].mxu1 %v5022_v14 }
 0x175   :  { %4376 = vmatpush3.bf16.msra.mxu1 %v4373_v48  ;;  %3612 = vmatprep.mubr.f32.mxu1 %v5026_v16 }
 0x176   :  { %3646 = vmatmul.mubr.bf16.gmra.mrb[8].mxu0 %v5056_v46  ;;  %4378 = vmatprep.subr.bf16.mxu1 %v4377_v53 }
 0x177   :  { %3649 = vmatprep.mubr.bf16.mxu0 %v5058_v47 }
 0x178   :  { %3613 = vmatmul.mubr.f32.gmra.mrb[26].mxu1 %v5028_v17 }
 0x179   :  { %4380 = vmatpush3.bf16.msra.mxu1 %v4377_v53  ;;  %3615 = vmatprep.mubr.f32.mxu1 %v5032_v19 }
 0x17a   :  { %4382 = vmatprep.subr.bf16.mxu1 %v4381_v56 }
 0x17c   :  { %3616 = vmatmul.mubr.f32.gmra.mrb[28].mxu1 %v5034_v20 }
 0x17d   :  { %3618 = vmatprep.mubr.f32.mxu1 %v5038_v22  ;;  %4384 = vmatpush3.bf16.msra.mxu1 %v4381_v56 }
 0x17e   :  { %3650 = vmatmul.mubr.bf16.gmra.mrb[12].mxu0 %v5062_v52  ;;  %4386 = vmatprep.subr.bf16.mxu1 %v4385_v12 }
 0x17f   :  { %3725 = vmatprep.mubr.bf16.mxu0 %v5014_v11 }
 0x180   :  { %3619 = vmatmul.mubr.f32.gmra.mrb[30].mxu1 %v5040_v23 }
 0x181   :  { %4388 = vmatpush3.bf16.msra.mxu1 %v4385_v12 }
 0x182   :  { %4390 = vmatprep.subr.bf16.mxu1 %v4389_v21 }
 0x239   :  { %v3639_v24 = vpop.f32.mrb[0].mxu0 }
 0x23a   :  { %v630_v25 = vpop.f32.mrb[1].mxu0  ;;  %v695_v34 = vmul.f32 2.0, %v3639_v24  ;;  %v1047_v24 = vld [vmem:[#allocation7 + $0x1b0] sm:$0xff] }
 0x23b   :  { %v693_v29 = vmul.f32 2.0, %v630_v25  ;;  %v3640_v32 = vpop.f32.mrb[2].mxu0  ;;  %v1048_v25 = vld [vmem:[#allocation7 + $0x1b8] sm:$0xff] }
 0x23c   :  { %v696_v35 = vmul.f32 2.0, %v3640_v32  ;;  %v633_v36 = vpop.f32.mrb[3].mxu0  ;;  %v5164_v53 = vsub.f32 %v695_v34, %v4996_v2  ;;  %v4397_v2 = vpack.c.bf16 %v1046_v55, %v1045_v54 }
 0x23d   :  { %v5154_v41 = vsub.f32 %v693_v29, %v4992_v0  ;;  %v694_v45 = vmul.f32 2.0, %v633_v36 }
 0x23e   :  { %v5157_v48 = vsub.f32 %v696_v35, %v5000_v4  ;;  %v4401_v35 = vpack.c.bf16 %v1048_v25, %v1047_v24 }
 0x23f   :  { %v5160_v50 = vsub.f32 %v694_v45, %v4994_v1  ;;  %3685 = vmatprep.mubr.f32.mxu1 %v5154_v41 }
 0x240   :  { %v904_v3 = vpack.c.bf16 %v5157_v48, %v5164_v53 }
 0x241   :  { %v3643_v56 = vpop.f32.mrb[4].mxu0  ;;  %3686 = vmatmul.mubr.f32.vlgmr.msra.gmra.mrb[16].mxu1 %v5160_v50  ;;  %v903_v0 = vpack.c.bf16 %v5160_v50, %v5154_v41 }
 0x242   :  { %v646_v60 = vpop.f32.mrb[5].mxu0  ;;  %3688 = vmatprep.mubr.f32.mxu1 %v5164_v53  ;;  %4392 = vmatpush3.bf16.msra.mxu1 %v4389_v21  ;;  %v699_v12 = vmul.f32 2.0, %v3643_v56 }
 0x243   :  { %v697_v1 = vmul.f32 2.0, %v646_v60  ;;  %v3644_v4 = vpop.f32.mrb[6].mxu0  ;;  %3709 = vmatprep.subr.bf16.mxu0 %v903_v0  ;;  %4394 = vmatprep.subr.bf16.mxu1 %v4393_v51  ;;  %v1051_v60 = vld [vmem:[#allocation7 + $0x1d0] sm:$0xff] }
 0x244   :  { %v700_v15 = vmul.f32 2.0, %v3644_v4  ;;  %v649_v18 = vpop.f32.mrb[7].mxu0  ;;  %3710 = vmatpush3.bf16.msra.mxu0 %v903_v0  ;;  %v5184_v36 = vsub.f32 %v699_v12, %v5008_v8 }
 0x245   :  { %v5173_v29 = vsub.f32 %v697_v1, %v5004_v6  ;;  %v698_v32 = vmul.f32 2.0, %v649_v18  ;;  %3689 = vmatmul.mubr.f32.gmra.mrb[18].mxu1 %v5157_v48  ;;  %3711 = vmatprep.subr.bf16.mxu0 %v904_v3  ;;  %v1049_v6 = vld [vmem:[#allocation7 + $0x1c0] sm:$0xff]  ;;  %v1052_v1 = vld [vmem:[#allocation7 + $0x1d8] sm:$0xff] }
 0x246   :  { %4396 = vmatpush3.bf16.msra.mxu1 %v4393_v51  ;;  %v5177_v21 = vsub.f32 %v700_v15, %v5012_v10  ;;  %v4405_v54 = vpack.c.bf16 %v1050_v37, %v1049_v6  ;;  %v4409_v15 = vpack.c.bf16 %v1052_v1, %v1051_v60 }
 0x247   :  { %v5180_v34 = vsub.f32 %v698_v32, %v5006_v7  ;;  %3691 = vmatprep.mubr.f32.mxu1 %v5173_v29  ;;  %4398 = vmatprep.subr.bf16.mxu1 %v4397_v2 }
 0x248   :  { %3712 = vmatpush3.bf16.msra.mxu0 %v904_v3  ;;  %v906_v8 = vpack.c.bf16 %v5177_v21, %v5184_v36 }
 0x249   :  { %v3647_v40 = vpop.f32.mrb[8].mxu0  ;;  %3692 = vmatmul.mubr.f32.gmra.mrb[20].mxu1 %v5180_v34  ;;  %v905_v10 = vpack.c.bf16 %v5180_v34, %v5173_v29 }
 0x24a   :  { %v662_v45 = vpop.f32.mrb[9].mxu0  ;;  %3694 = vmatprep.mubr.f32.mxu1 %v5184_v36  ;;  %4400 = vmatpush3.bf16.msra.mxu1 %v4397_v2  ;;  %v703_v55 = vmul.f32 2.0, %v3647_v40 }
 0x24b   :  { %v701_v7 = vmul.f32 2.0, %v662_v45  ;;  %v3648_v51 = vpop.f32.mrb[10].mxu0  ;;  %3713 = vmatprep.subr.bf16.mxu0 %v905_v10  ;;  %4402 = vmatprep.subr.bf16.mxu1 %v4401_v35 }
 0x24c   :  { %v704_v56 = vmul.f32 2.0, %v3648_v51  ;;  %v665_v0 = vpop.f32.mrb[11].mxu0  ;;  %3714 = vmatpush3.bf16.msra.mxu0 %v905_v10  ;;  %v5204_v18 = vsub.f32 %v703_v55, %v5026_v16 }
 0x24d   :  { %v5193_v4 = vsub.f32 %v701_v7, %v5019_v13  ;;  %v702_v3 = vmul.f32 2.0, %v665_v0  ;;  %3695 = vmatmul.mubr.f32.gmra.mrb[22].mxu1 %v5177_v21  ;;  %3715 = vmatprep.subr.bf16.mxu0 %v906_v8  ;;  %v1357_v0 = vld [vmem:[#allocation7 + $0x208] sm:$0xff] }
 0x24e   :  { %4404 = vmatpush3.bf16.msra.mxu1 %v4401_v35  ;;  %v5197_v2 = vsub.f32 %v704_v56, %v5028_v17  ;;  %v1356_v56 = vld [vmem:[#allocation7 + $0x200] sm:$0xff] }
 0x24f   :  { %v5200_v12 = vsub.f32 %v702_v3, %v5022_v14  ;;  %3697 = vmatprep.mubr.f32.mxu1 %v5193_v4  ;;  %4406 = vmatprep.subr.bf16.mxu1 %v4405_v54  ;;  %v4421_v60 = vpack.c.bf16 %v1357_v0, %v1356_v56 }
 0x250   :  { %3716 = vmatpush3.bf16.msra.mxu0 %v906_v8  ;;  %v908_v32 = vpack.c.bf16 %v5197_v2, %v5204_v18  ;;  %v1055_v8 = vld [vmem:[#allocation7 + $0x1f0] sm:$0xff] }
 0x251   :  { %v3651_v13 = vpop.f32.mrb[12].mxu0  ;;  %3698 = vmatmul.mubr.f32.gmra.mrb[24].mxu1 %v5200_v12  ;;  %v907_v24 = vpack.c.bf16 %v5200_v12, %v5193_v4 }
 0x252   :  { %v678_v25 = vpop.f32.mrb[13].mxu0  ;;  %3700 = vmatprep.mubr.f32.mxu1 %v5204_v18  ;;  %4408 = vmatpush3.bf16.msra.mxu1 %v4405_v54  ;;  %v707_v16 = vmul.f32 2.0, %v3651_v13  ;;  %v1056_v54 = vld [vmem:[#allocation7 + $0x1f8] sm:$0xff] }
 0x253   :  { %v705_v14 = vmul.f32 2.0, %v678_v25  ;;  %v3652_v17 = vpop.f32.mrb[14].mxu0  ;;  %3717 = vmatprep.subr.bf16.mxu0 %v907_v24  ;;  %4410 = vmatprep.subr.bf16.mxu1 %v4409_v15  ;;  %v4417_v55 = vpack.c.bf16 %v1056_v54, %v1055_v8 }
 0x254   :  { %v708_v35 = vmul.f32 2.0, %v3652_v17  ;;  %v681_v6 = vpop.f32.mrb[15].mxu0  ;;  %3718 = vmatpush3.bf16.msra.mxu0 %v907_v24  ;;  %v5224_v7 = vsub.f32 %v707_v16, %v5038_v22  ;;  %v1054_v22 = vld [vmem:[#allocation7 + $0x1e8] sm:$0xff]  ;;  %v1358_v17 = vld [vmem:[#allocation7 + $0x210] sm:$0xff] }
 0x255   :  { %v5213_v37 = vsub.f32 %v705_v14, %v5032_v19  ;;  %v706_v40 = vmul.f32 2.0, %v681_v6  ;;  %3701 = vmatmul.mubr.f32.gmra.mrb[26].mxu1 %v5197_v2  ;;  %3719 = vmatprep.subr.bf16.mxu0 %v908_v32 }
 0x256   :  { %4412 = vmatpush3.bf16.msra.mxu1 %v4409_v15  ;;  %v5217_v10 = vsub.f32 %v708_v35, %v5040_v23 }
 0x257   :  { %v5220_v45 = vsub.f32 %v706_v40, %v5034_v20  ;;  %3703 = vmatprep.mubr.f32.mxu1 %v5213_v37  ;;  %v1053_v20 = vld [vmem:[#allocation7 + $0x1e0] sm:$0xff] }
 0x258   :  { %3720 = vmatpush3.bf16.msra.mxu0 %v908_v32  ;;  %v910_v23 = vpack.c.bf16 %v5217_v10, %v5224_v7  ;;  %v4413_v51 = vpack.c.bf16 %v1054_v22, %v1053_v20  ;;  %v1359_v32 = vld [vmem:[#allocation7 + $0x218] sm:$0xff]  ;;  %v1360_v20 = vld [vmem:[#allocation7 + $0x220] sm:$0xff]  ;;  %v1361_v22 = vld [vmem:[#allocation7 + $0x228] sm:$0xff] }
 0x259   :  { %3704 = vmatmul.mubr.f32.gmra.mrb[28].mxu1 %v5220_v45  ;;  %v909_v19 = vpack.c.bf16 %v5220_v45, %v5213_v37 }
 0x25a   :  { %3706 = vmatprep.mubr.f32.mxu1 %v5224_v7  ;;  %4414 = vmatprep.subr.bf16.mxu1 %v4413_v51 }
 0x25b   :  { %3721 = vmatprep.subr.bf16.mxu0 %v909_v19  ;;  %4416 = vmatpush3.bf16.msra.mxu1 %v4413_v51 }
 0x25c   :  { %3722 = vmatpush3.bf16.msra.mxu0 %v909_v19  ;;  %4418 = vmatprep.subr.bf16.mxu1 %v4417_v55  ;;  %v4425_v19 = vpack.c.bf16 %v1359_v32, %v1358_v17 }
 0x25d   :  { %3707 = vmatmul.mubr.f32.gmra.mrb[30].mxu1 %v5217_v10  ;;  %3723 = vmatprep.subr.bf16.mxu0 %v910_v23 }
 0x25f   :  { %4420 = vmatpush3.bf16.msra.mxu1 %v4417_v55 }
 0x260   :  { %3724 = vmatpush3.bf16.msra.mxu0 %v910_v23  ;;  %4422 = vmatprep.subr.bf16.mxu1 %v4421_v60 }
 0x263   :  { %3726 = vmatmul.mubr.bf16.vlgmr.msra.gmra.mrb[16].mxu0 %v5044_v30 }
 0x264   :  { %3729 = vmatprep.mubr.bf16.mxu0 %v5046_v31 }
 0x26b   :  { %3730 = vmatmul.mubr.bf16.gmra.mrb[20].mxu0 %v5050_v38 }
 0x26c   :  { %3733 = vmatprep.mubr.bf16.mxu0 %v5052_v39 }
 0x273   :  { %3734 = vmatmul.mubr.bf16.gmra.mrb[24].mxu0 %v5056_v46 }
 0x274   :  { %3737 = vmatprep.mubr.bf16.mxu0 %v5058_v47 }
 0x27b   :  { %3738 = vmatmul.mubr.bf16.gmra.mrb[28].mxu0 %v5062_v52 }
 0x27c   :  { %3813 = vmatprep.mubr.bf16.mxu0 %v5014_v11 }
 0x336   :  { %v3727_v1 = vpop.f32.mrb[16].mxu0 }
 0x337   :  { %v1010_v3 = vmul.f32 2.0, %v3727_v1  ;;  %v945_v15 = vpop.f32.mrb[17].mxu0  ;;  %v1362_v1 = vld [vmem:[#allocation7 + $0x230] sm:$0xff] }
 0x338   :  { %v1008_v13 = vmul.f32 2.0, %v945_v15  ;;  %v3728_v24 = vpop.f32.mrb[18].mxu0 }
 0x339   :  { %v1026_v11 = vsub.f32 %v1010_v3, %v5065_v61  ;;  %v1011_v25 = vmul.f32 2.0, %v3728_v24  ;;  %v948_v14 = vpop.f32.mrb[19].mxu0  ;;  %v1363_v3 = vld [vmem:[#allocation7 + $0x238] sm:$0xff] }
 0x33a   :  { %v1024_v16 = vsub.f32 %v1008_v13, %v5067_v62  ;;  %v1009_v35 = vmul.f32 2.0, %v948_v14  ;;  %v4429_v62 = vpack.c.bf16 %v1361_v22, %v1360_v20  ;;  %v1365_v14 = vld [vmem:[#allocation7 + $0x248] sm:$0xff]  ;;  %v1367_v20 = vld [vmem:[#allocation7 + $0x258] sm:$0xff] }
 0x33b   :  { %v1027_v6 = vsub.f32 %v1011_v25, %v5069_v63  ;;  %v1364_v25 = vld [vmem:[#allocation7 + $0x240] sm:$0xff] }
 0x33c   :  { %v1025_v40 = vsub.f32 %v1009_v35, %v5074_v9  ;;  %3773 = vmatprep.mubr.f32.mxu1 %v1024_v16 }
 0x33d   :  { %v1219_v23 = vpack.c.bf16 %v1027_v6, %v1026_v11 }
 0x33e   :  { %v3731_v51 = vpop.f32.mrb[20].mxu0  ;;  %3774 = vmatmul.mubr.f32.vlgmr.msra.gmra.mrb[16].mxu1 %v1025_v40  ;;  %v1218_v8 = vpack.c.bf16 %v1025_v40, %v1024_v16 }
 0x33f   :  { %v1014_v61 = vmul.f32 2.0, %v3731_v51  ;;  %v961_v54 = vpop.f32.mrb[21].mxu0  ;;  %3776 = vmatprep.mubr.f32.mxu1 %v1026_v11  ;;  %4424 = vmatpush3.bf16.msra.mxu1 %v4421_v60  ;;  %v4433_v11 = vpack.c.bf16 %v1363_v3, %v1362_v1 }
 0x340   :  { %v1012_v55 = vmul.f32 2.0, %v961_v54  ;;  %v3732_v56 = vpop.f32.mrb[22].mxu0  ;;  %3797 = vmatprep.subr.bf16.mxu0 %v1218_v8  ;;  %4426 = vmatprep.subr.bf16.mxu1 %v4425_v19 }
 0x341   :  { %v1030_v63 = vsub.f32 %v1014_v61, %v5080_v26  ;;  %v1015_v9 = vmul.f32 2.0, %v3732_v56  ;;  %v964_v0 = vpop.f32.mrb[23].mxu0  ;;  %3798 = vmatpush3.bf16.msra.mxu0 %v1218_v8 }
 0x342   :  { %v1028_v15 = vsub.f32 %v1012_v55, %v5083_v27  ;;  %v1013_v13 = vmul.f32 2.0, %v964_v0  ;;  %3777 = vmatmul.mubr.f32.gmra.mrb[18].mxu1 %v1027_v6  ;;  %3799 = vmatprep.subr.bf16.mxu0 %v1219_v23 }
 0x343   :  { %v1031_v24 = vsub.f32 %v1015_v9, %v5085_v28  ;;  %4428 = vmatpush3.bf16.msra.mxu1 %v4425_v19  ;;  %v4437_v28 = vpack.c.bf16 %v1365_v14, %v1364_v25 }
 0x344   :  { %v1029_v60 = vsub.f32 %v1013_v13, %v5090_v33  ;;  %3779 = vmatprep.mubr.f32.mxu1 %v1028_v15  ;;  %4430 = vmatprep.subr.bf16.mxu1 %v4429_v62 }
 0x345   :  { %3800 = vmatpush3.bf16.msra.mxu0 %v1219_v23  ;;  %v1221_v26 = vpack.c.bf16 %v1031_v24, %v1030_v63  ;;  %v1366_v23 = vld [vmem:[#allocation7 + $0x250] sm:$0xff] }
 0x346   :  { %v3735_v17 = vpop.f32.mrb[24].mxu0  ;;  %3780 = vmatmul.mubr.f32.gmra.mrb[20].mxu1 %v1029_v60  ;;  %v1220_v32 = vpack.c.bf16 %v1029_v60, %v1028_v15  ;;  %v4441_v54 = vpack.c.bf16 %v1367_v20, %v1366_v23 }
 0x347   :  { %v1018_v16 = vmul.f32 2.0, %v3735_v17  ;;  %v977_v27 = vpop.f32.mrb[25].mxu0  ;;  %3782 = vmatprep.mubr.f32.mxu1 %v1030_v63  ;;  %4432 = vmatpush3.bf16.msra.mxu1 %v4429_v62 }
 0x348   :  { %v1016_v35 = vmul.f32 2.0, %v977_v27  ;;  %v3736_v6 = vpop.f32.mrb[26].mxu0  ;;  %3801 = vmatprep.subr.bf16.mxu0 %v1220_v32  ;;  %4434 = vmatprep.subr.bf16.mxu1 %v4433_v11 }
 0x349   :  { %v1034_v33 = vsub.f32 %v1018_v16, %v5096_v42  ;;  %v1019_v40 = vmul.f32 2.0, %v3736_v6  ;;  %v980_v19 = vpop.f32.mrb[27].mxu0  ;;  %3802 = vmatpush3.bf16.msra.mxu0 %v1220_v32 }
 0x34a   :  { %v1032_v22 = vsub.f32 %v1016_v35, %v5099_v43  ;;  %v1017_v51 = vmul.f32 2.0, %v980_v19  ;;  %3783 = vmatmul.mubr.f32.gmra.mrb[22].mxu1 %v1031_v24  ;;  %3803 = vmatprep.subr.bf16.mxu0 %v1221_v26 }
 0x34b   :  { %v1035_v8 = vsub.f32 %v1019_v40, %v5101_v44  ;;  %4436 = vmatpush3.bf16.msra.mxu1 %v4433_v11 }
 0x34c   :  { %v1033_v61 = vsub.f32 %v1017_v51, %v5106_v49  ;;  %3785 = vmatprep.mubr.f32.mxu1 %v1032_v22  ;;  %4438 = vmatprep.subr.bf16.mxu1 %v4437_v28 }
 0x34d   :  { %3804 = vmatpush3.bf16.msra.mxu0 %v1221_v26  ;;  %v1223_v42 = vpack.c.bf16 %v1035_v8, %v1034_v33 }
 0x34e   :  { %v3739_v55 = vpop.f32.mrb[28].mxu0  ;;  %3786 = vmatmul.mubr.f32.gmra.mrb[24].mxu1 %v1033_v61  ;;  %v1222_v56 = vpack.c.bf16 %v1033_v61, %v1032_v22 }
 0x34f   :  { %v1022_v62 = vmul.f32 2.0, %v3739_v55  ;;  %v993_v63 = vpop.f32.mrb[29].mxu0  ;;  %3788 = vmatprep.mubr.f32.mxu1 %v1034_v33  ;;  %4440 = vmatpush3.bf16.msra.mxu1 %v4437_v28 }
 0x350   :  { %v1020_v43 = vmul.f32 2.0, %v993_v63  ;;  %v3740_v9 = vpop.f32.mrb[30].mxu0  ;;  %3805 = vmatprep.subr.bf16.mxu0 %v1222_v56  ;;  %4442 = vmatprep.subr.bf16.mxu1 %v4441_v54 }
 0x351   :  { %v1038_v44 = vsub.f32 %v1022_v62, %v5112_v57  ;;  %v1023_v0 = vmul.f32 2.0, %v3740_v9  ;;  %v996_v49 = vpop.f32.mrb[31].mxu0  ;;  %3806 = vmatpush3.bf16.msra.mxu0 %v1222_v56  ;;  %v5264_v57 = vld [vmem:[#allocation2] sm:$0xff]  }
 0x352   :  { %v1036_v1 = vsub.f32 %v1020_v43, %v5115_v58  ;;  %v1021_v3 = vmul.f32 2.0, %v996_v49  ;;  %3789 = vmatmul.mubr.f32.gmra.mrb[26].mxu1 %v1035_v8  ;;  %3807 = vmatprep.subr.bf16.mxu0 %v1223_v42  ;;  %v1368_v58 = vld [vmem:[#allocation7 + $0x260] sm:$0xff] }
 0x353   :  { %v1039_v15 = vsub.f32 %v1023_v0, %v5117_v59  ;;  %4444 = vmatpush3.bf16.msra.mxu1 %v4441_v54  ;;  %v1369_v59 = vld [vmem:[#allocation7 + $0x268] sm:$0xff] }
 0x354   :  { %v1037_v13 = vsub.f32 %v1021_v3, %v5122_v5  ;;  %3791 = vmatprep.mubr.f32.mxu1 %v1036_v1  ;;  %v4445_v5 = vpack.c.bf16 %v1369_v59, %v1368_v58 }
 0x355   :  { %3808 = vmatpush3.bf16.msra.mxu0 %v1223_v42  ;;  %v1225_v24 = vpack.c.bf16 %v1039_v15, %v1038_v44 }
 0x356   :  { %3792 = vmatmul.mubr.f32.gmra.mrb[28].mxu1 %v1037_v13  ;;  %v1224_v60 = vpack.c.bf16 %v1037_v13, %v1036_v1  ;;  %4446 = vmatprep.subr.bf16.mxu1 %v4445_v5 }
 0x357   :  { %3794 = vmatprep.mubr.f32.mxu1 %v1038_v44  ;;  %4448 = vmatpush3.bf16.msra.mxu1 %v4445_v5 }
 0x358   :  { %3809 = vmatprep.subr.bf16.mxu0 %v1224_v60 }
 0x359   :  { %3810 = vmatpush3.bf16.msra.mxu0 %v1224_v60 }
 0x35a   :  { %3795 = vmatmul.mubr.f32.gmra.mrb[30].mxu1 %v1039_v15  ;;  %3811 = vmatprep.subr.bf16.mxu0 %v1225_v24 }
 0x35d   :  { %3812 = vmatpush3.bf16.msra.mxu0 %v1225_v24 }
 0x360   :  { %3814 = vmatmul.mubr.bf16.vlgmr.msra.gmra.mrb[32].mxu0 %v5044_v30  ;;  %v1370_v30 = vld [vmem:[#allocation7 + $0x270] sm:$0xff] }
 0x361   :  { %3817 = vmatprep.mubr.bf16.mxu0 %v5046_v31  ;;  %v1371_v31 = vld [vmem:[#allocation7 + $0x278] sm:$0xff] }
 0x368   :  { %3818 = vmatmul.mubr.bf16.gmra.mrb[36].mxu0 %v5050_v38  ;;  %v4449_v38 = vpack.c.bf16 %v1371_v31, %v1370_v30 }
 0x369   :  { %3821 = vmatprep.mubr.bf16.mxu0 %v5052_v39 }
 0x36a   :  { %4450 = vmatprep.subr.bf16.mxu1 %v4449_v38 }
 0x36b   :  { %4452 = vmatpush3.bf16.msra.mxu1 %v4449_v38 }
 0x370   :  { %3822 = vmatmul.mubr.bf16.gmra.mrb[40].mxu0 %v5056_v46 }
 0x371   :  { %3825 = vmatprep.mubr.bf16.mxu0 %v5058_v47 }
 0x378   :  { %3826 = vmatmul.mubr.bf16.gmra.mrb[44].mxu0 %v5062_v52 }
 0x379   :  { %3901 = vmatprep.mubr.bf16.mxu0 %v5264_v57 }
 0x433   :  { %v3815_v39 = vpop.f32.mrb[32].mxu0 }
 0x434   :  { %v1260_v46 = vpop.f32.mrb[33].mxu0  ;;  %v1325_v26 = vmul.f32 2.0, %v3815_v39 }
 0x435   :  { %v1323_v11 = vmul.f32 2.0, %v1260_v46  ;;  %v3816_v47 = vpop.f32.mrb[34].mxu0 }
 0x436   :  { %v1263_v52 = vpop.f32.mrb[35].mxu0  ;;  %v1326_v17 = vmul.f32 2.0, %v3816_v47  ;;  %v1341_v16 = vsub.f32 %v1325_v26, %v5164_v53 }
 0x437   :  { %v1339_v25 = vsub.f32 %v1323_v11, %v5154_v41  ;;  %v1324_v14 = vmul.f32 2.0, %v1263_v52 }
 0x438   :  { %v1342_v6 = vsub.f32 %v1326_v17, %v5157_v48 }
 0x439   :  { %v1340_v32 = vsub.f32 %v1324_v14, %v5160_v50  ;;  %3861 = vmatprep.mubr.f32.mxu1 %v1339_v25 }
 0x43b   :  { %v3819_v27 = vpop.f32.mrb[36].mxu0  ;;  %3862 = vmatmul.mubr.f32.vlgmr.msra.gmra.mrb[16].mxu1 %v1340_v32 }
 0x43c   :  { %v1276_v35 = vpop.f32.mrb[37].mxu0  ;;  %3864 = vmatprep.mubr.f32.mxu1 %v1341_v16  ;;  %v1329_v40 = vmul.f32 2.0, %v3819_v27 }
 0x43d   :  { %v1327_v28 = vmul.f32 2.0, %v1276_v35  ;;  %v3820_v33 = vpop.f32.mrb[38].mxu0 }
 0x43e   :  { %v1279_v19 = vpop.f32.mrb[39].mxu0  ;;  %v1330_v20 = vmul.f32 2.0, %v3820_v33  ;;  %v1345_v53 = vsub.f32 %v1329_v40, %v5184_v36 }
 0x43f   :  { %v1343_v23 = vsub.f32 %v1327_v28, %v5173_v29  ;;  %v1328_v41 = vmul.f32 2.0, %v1279_v19  ;;  %3865 = vmatmul.mubr.f32.gmra.mrb[18].mxu1 %v1342_v6 }
 0x440   :  { %v1346_v48 = vsub.f32 %v1330_v20, %v5177_v21 }
 0x441   :  { %v1344_v50 = vsub.f32 %v1328_v41, %v5180_v34  ;;  %3867 = vmatprep.mubr.f32.mxu1 %v1343_v23 }
 0x443   :  { %v3823_v22 = vpop.f32.mrb[40].mxu0  ;;  %3868 = vmatmul.mubr.f32.gmra.mrb[20].mxu1 %v1344_v50 }
 0x444   :  { %v1292_v51 = vpop.f32.mrb[41].mxu0  ;;  %3870 = vmatprep.mubr.f32.mxu1 %v1345_v53  ;;  %v1333_v54 = vmul.f32 2.0, %v3823_v22 }
 0x445   :  { %v1331_v8 = vmul.f32 2.0, %v1292_v51  ;;  %v3824_v61 = vpop.f32.mrb[42].mxu0 }
 0x446   :  { %v1295_v42 = vpop.f32.mrb[43].mxu0  ;;  %v1334_v56 = vmul.f32 2.0, %v3824_v61  ;;  %v1349_v36 = vsub.f32 %v1333_v54, %v5204_v18 }
 0x447   :  { %v1347_v29 = vsub.f32 %v1331_v8, %v5193_v4  ;;  %v1332_v55 = vmul.f32 2.0, %v1295_v42  ;;  %3871 = vmatmul.mubr.f32.gmra.mrb[22].mxu1 %v1346_v48 }
 0x448   :  { %v1350_v21 = vsub.f32 %v1334_v56, %v5197_v2  ;;  %v5287_v2 = vld [vmem:[%s5610_s3] ss:$0 sm:$0xff] }
 0x449   :  { %v1348_v34 = vsub.f32 %v1332_v55, %v5200_v12  ;;  %3873 = vmatprep.mubr.f32.mxu1 %v1347_v29 }
 0x44b   :  { %v3827_v62 = vpop.f32.mrb[44].mxu0  ;;  %3874 = vmatmul.mubr.f32.gmra.mrb[24].mxu1 %v1348_v34 }
 0x44c   :  { %v1308_v63 = vpop.f32.mrb[45].mxu0  ;;  %3876 = vmatprep.mubr.f32.mxu1 %v1349_v36  ;;  %v1337_v44 = vmul.f32 2.0, %v3827_v62 }
 0x44d   :  { %v1335_v43 = vmul.f32 2.0, %v1308_v63  ;;  %v3828_v9 = vpop.f32.mrb[46].mxu0 }
 0x44e   :  { %v1311_v0 = vpop.f32.mrb[47].mxu0  ;;  %v1338_v1 = vmul.f32 2.0, %v3828_v9  ;;  %v1353_v18 = vsub.f32 %v1337_v44, %v5224_v7  ;;  %v1694_v44 = vld [vmem:[#allocation8 + $0x80] sm:$0xff] }
 0x44f   :  { %v1351_v4 = vsub.f32 %v1335_v43, %v5213_v37  ;;  %v1336_v49 = vmul.f32 2.0, %v1311_v0  ;;  %3877 = vmatmul.mubr.f32.gmra.mrb[26].mxu1 %v1350_v21  ;;  %v1695_v0 = vld [vmem:[#allocation8 + $0x88] sm:$0xff] }
 0x450   :  { %v1354_v3 = vsub.f32 %v1338_v1, %v5217_v10  ;;  %v4453_v1 = vpack.c.bf16 %v1695_v0, %v1694_v44  ;;  %v1578_v44 = vld [vmem:[#allocation8 + $0x30] sm:$0xff]  ;;  %v1579_v0 = vld [vmem:[#allocation8 + $0x38] sm:$0xff] }
 0x451   :  { %v1352_v12 = vsub.f32 %v1336_v49, %v5220_v45  ;;  %3879 = vmatprep.mubr.f32.mxu1 %v1351_v4 }
 0x453   :  { %3880 = vmatmul.mubr.f32.gmra.mrb[28].mxu1 %v1352_v12  ;;  %v1696_v12 = vld [vmem:[#allocation8 + $0x90] sm:$0xff] }
 0x454   :  { %3882 = vmatprep.mubr.f32.mxu1 %v1353_v18  ;;  %v1697_v18 = vld [vmem:[#allocation8 + $0x98] sm:$0xff] }
 0x457   :  { %3883 = vmatmul.mubr.f32.gmra.mrb[30].mxu1 %v1354_v3  ;;  %v4457_v3 = vpack.c.bf16 %v1697_v18, %v1696_v12  ;;  %v4497_v18 = vpack.c.bf16 %v1579_v0, %v1578_v44  ;;  %v2140_v44 = vld [vmem:[#allocation8 + $0x110] sm:$0xff]  ;;  %v2141_v0 = vld [vmem:[#allocation8 + $0x118] sm:$0xff] }
 0x458   :  { %4045 = vmatprep.mubr.bf16.mxu1 %v5264_v57 }
 0x50e   :  { %v3863_v37 = vpop.f32.mrb[16].mxu1 }
 0x50f   :  { %v1541_v15 = vadd.f32 %v3863_v37, %v5287_v2  ;;  %v1438_v13 = vpop.f32.mrb[17].mxu1  ;;  %v1699_v37 = vld [vmem:[#allocation8 + $0xa8] sm:$0xff] }
 0x510   :  { %v1540_v45 = vadd.f32 %v5287_v2, %v1438_v13  ;;  %v5356_v13 = vld [vmem:[#allocation2 + $0x10] sm:$0xff]  }
 0x511   :  { %v5291_v24 = vmax.f32 %v1541_v15, 0.0  ;;  %v5353_v15 = vld [vmem:[#allocation2 + $0x8] sm:$0xff]  }
 0x512   :  { %v5293_v7 = vmax.f32 %v1540_v45, 0.0  ;;  %v3866_v60 = vpop.f32.mrb[18].mxu1 }
 0x513   :  { %v1543_v10 = vadd.f32 %v3866_v60, %v5287_v2  ;;  %v1448_v58 = vpop.f32.mrb[19].mxu1  ;;  %v1700_v60 = vld [vmem:[#allocation8 + $0xb0] sm:$0xff] }
 0x514   :  { %v1542_v59 = vadd.f32 %v5287_v2, %v1448_v58  ;;  %v1588_v5 = vpack.c.bf16 %v5291_v24, %v5293_v7 }
 0x515   :  { %v5299_v30 = vmax.f32 %v1543_v10, 0.0  ;;  %v1701_v10 = vld [vmem:[#allocation8 + $0xb8] sm:$0xff] }
 0x516   :  { %v5301_v31 = vmax.f32 %v1542_v59, 0.0  ;;  %v3869_v38 = vpop.f32.mrb[20].mxu1  ;;  %3885 = vmatprep.subr.bf16.mxu0 %v1588_v5  ;;  %v4465_v58 = vpack.c.bf16 %v1701_v10, %v1700_v60  ;;  %v1702_v59 = vld [vmem:[#allocation8 + $0xc0] sm:$0xff] }
 0x517   :  { %v1545_v39 = vadd.f32 %v3869_v38, %v5287_v2  ;;  %v1458_v46 = vpop.f32.mrb[21].mxu1  ;;  %3886 = vmatpush3.bf16.msra.mxu0 %v1588_v5  ;;  %v1703_v5 = vld [vmem:[#allocation8 + $0xc8] sm:$0xff]  ;;  %v5359_v38 = vld [vmem:[#allocation2 + $0x18] sm:$0xff]  }
 0x518   :  { %v1544_v11 = vadd.f32 %v5287_v2, %v1458_v46  ;;  %v1589_v47 = vpack.c.bf16 %v5299_v30, %v5301_v31  ;;  %v4469_v46 = vpack.c.bf16 %v1703_v5, %v1702_v59  ;;  %v1583_v59 = vld [vmem:[#allocation8 + $0x58] sm:$0xff] }
 0x519   :  { %v5307_v26 = vmax.f32 %v1545_v39, 0.0  ;;  %v5362_v39 = vld [vmem:[#allocation2 + $0x20] sm:$0xff]  }
 0x51a   :  { %v5309_v52 = vmax.f32 %v1544_v11, 0.0  ;;  %v3872_v25 = vpop.f32.mrb[22].mxu1  ;;  %3887 = vmatprep.subr.bf16.mxu0 %v1589_v47  ;;  %v1704_v11 = vld [vmem:[#allocation8 + $0xd0] sm:$0xff] }
 0x51b   :  { %v1547_v14 = vadd.f32 %v3872_v25, %v5287_v2  ;;  %v1468_v17 = vpop.f32.mrb[23].mxu1  ;;  %3888 = vmatpush3.bf16.msra.mxu0 %v1589_v47  ;;  %v1705_v47 = vld [vmem:[#allocation8 + $0xd8] sm:$0xff] }
 0x51c   :  { %v1546_v32 = vadd.f32 %v5287_v2, %v1468_v17  ;;  %v1590_v16 = vpack.c.bf16 %v5307_v26, %v5309_v52  ;;  %v4473_v25 = vpack.c.bf16 %v1705_v47, %v1704_v11  ;;  %v1707_v17 = vld [vmem:[#allocation8 + $0xe8] sm:$0xff] }
 0x51d   :  { %v5315_v27 = vmax.f32 %v1547_v14, 0.0  ;;  %v1706_v14 = vld [vmem:[#allocation8 + $0xe0] sm:$0xff] }
 0x51e   :  { %v5317_v35 = vmax.f32 %v1546_v32, 0.0  ;;  %v3875_v6 = vpop.f32.mrb[24].mxu1  ;;  %3889 = vmatprep.subr.bf16.mxu0 %v1590_v16  ;;  %v5365_v32 = vld [vmem:[#allocation2 + $0x28] sm:$0xff]  }
 0x51f   :  { %v1549_v28 = vadd.f32 %v3875_v6, %v5287_v2  ;;  %v1478_v33 = vpop.f32.mrb[25].mxu1  ;;  %3890 = vmatpush3.bf16.msra.mxu0 %v1590_v16  ;;  %v5368_v16 = vld [vmem:[#allocation2 + $0x30] sm:$0xff]   ;;  %v4477_v6 = vpack.c.bf16 %v1707_v17, %v1706_v14  ;;  %v1584_v17 = vld [vmem:[#allocation8 + $0x60] sm:$0xff] }
 0x520   :  { %v1548_v40 = vadd.f32 %v5287_v2, %v1478_v33  ;;  %v1591_v19 = vpack.c.bf16 %v5315_v27, %v5317_v35  ;;  %v1708_v33 = vld [vmem:[#allocation8 + $0xf0] sm:$0xff] }
 0x521   :  { %v5323_v23 = vmax.f32 %v1549_v28, 0.0  ;;  %v5371_v28 = vld [vmem:[#allocation2 + $0x38] sm:$0xff]  }
 0x522   :  { %v5325_v41 = vmax.f32 %v1548_v40, 0.0  ;;  %v3878_v20 = vpop.f32.mrb[26].mxu1  ;;  %3891 = vmatprep.subr.bf16.mxu0 %v1591_v19  ;;  %v1709_v40 = vld [vmem:[#allocation8 + $0xf8] sm:$0xff] }
 0x523   :  { %v1551_v50 = vadd.f32 %v3878_v20, %v5287_v2  ;;  %v1488_v53 = vpop.f32.mrb[27].mxu1  ;;  %3892 = vmatpush3.bf16.msra.mxu0 %v1591_v19  ;;  %v4481_v19 = vpack.c.bf16 %v1709_v40, %v1708_v33  ;;  %v1572_v20 = vld [vmem:[#allocation8] sm:$0xff] }
 0x524   :  { %v1550_v22 = vadd.f32 %v5287_v2, %v1488_v53  ;;  %v1592_v51 = vpack.c.bf16 %v5323_v23, %v5325_v41 }
 0x525   :  { %v5331_v48 = vmax.f32 %v1551_v50, 0.0  ;;  %v1573_v50 = vld [vmem:[#allocation8 + $0x8] sm:$0xff] }
 0x526   :  { %v5333_v8 = vmax.f32 %v1550_v22, 0.0  ;;  %v3881_v61 = vpop.f32.mrb[28].mxu1  ;;  %3893 = vmatprep.subr.bf16.mxu0 %v1592_v51  ;;  %v4485_v53 = vpack.c.bf16 %v1573_v50, %v1572_v20  ;;  %v1574_v22 = vld [vmem:[#allocation8 + $0x10] sm:$0xff]  ;;  %v1587_v20 = vld [vmem:[#allocation8 + $0x78] sm:$0xff] }
 0x527   :  { %v1553_v54 = vadd.f32 %v3881_v61, %v5287_v2  ;;  %v1498_v42 = vpop.f32.mrb[29].mxu1  ;;  %3894 = vmatpush3.bf16.msra.mxu0 %v1592_v51  ;;  %v1575_v51 = vld [vmem:[#allocation8 + $0x18] sm:$0xff] }
 0x528   :  { %v1552_v29 = vadd.f32 %v5287_v2, %v1498_v42  ;;  %v1593_v55 = vpack.c.bf16 %v5331_v48, %v5333_v8 }
 0x529   :  { %v5339_v56 = vmax.f32 %v1553_v54, 0.0 }
 0x52a   :  { %v5341_v34 = vmax.f32 %v1552_v29, 0.0  ;;  %v3884_v36 = vpop.f32.mrb[30].mxu1  ;;  %3895 = vmatprep.subr.bf16.mxu0 %v1593_v55  ;;  %v4489_v29 = vpack.c.bf16 %v1575_v51, %v1574_v22 }
 0x52b   :  { %v1555_v62 = vadd.f32 %v3884_v36, %v5287_v2  ;;  %v1508_v63 = vpop.f32.mrb[31].mxu1  ;;  %3896 = vmatpush3.bf16.msra.mxu0 %v1593_v55 }
 0x52c   :  { %v1554_v21 = vadd.f32 %v5287_v2, %v1508_v63  ;;  %v1594_v43 = vpack.c.bf16 %v5339_v56, %v5341_v34  ;;  %v1698_v2 = vld [vmem:[#allocation8 + $0xa0] sm:$0xff]  ;;  %v1577_v63 = vld [vmem:[#allocation8 + $0x28] sm:$0xff] }
 0x52d   :  { %v5347_v9 = vmax.f32 %v1555_v62, 0.0  ;;  %v4461_v45 = vpack.c.bf16 %v1699_v37, %v1698_v2  ;;  %v1576_v62 = vld [vmem:[#allocation8 + $0x20] sm:$0xff] }
 0x52e   :  { %v5349_v4 = vmax.f32 %v1554_v21, 0.0  ;;  %3897 = vmatprep.subr.bf16.mxu0 %v1594_v43  ;;  %v1580_v37 = vld [vmem:[#allocation8 + $0x40] sm:$0xff] }
 0x52f   :  { %3898 = vmatpush3.bf16.msra.mxu0 %v1594_v43  ;;  %v4493_v43 = vpack.c.bf16 %v1577_v63, %v1576_v62  ;;  %v2138_v62 = vld [vmem:[#allocation8 + $0x100] sm:$0xff]  ;;  %v2139_v63 = vld [vmem:[#allocation8 + $0x108] sm:$0xff] }
 0x530   :  { %v1595_v49 = vpack.c.bf16 %v5347_v9, %v5349_v4 }
 0x532   :  { %3899 = vmatprep.subr.bf16.mxu0 %v1595_v49 }
 0x533   :  { %3900 = vmatpush3.bf16.msra.mxu0 %v1595_v49 }
 0x534   :  { %4454 = vmatprep.subr.bf16.mxu0 %v4453_v1 }
 0x536   :  { %3902 = vmatmul.mubr.bf16.vlgmr.msra.gmra.mrb[48].mxu0 %v5353_v15 }
 0x537   :  { %3905 = vmatprep.mubr.bf16.mxu0 %v5356_v13  ;;  %4456 = vmatpush3.bf16.msra.mxu0 %v4453_v1 }
 0x538   :  { %4458 = vmatprep.subr.bf16.mxu0 %v4457_v3 }
 0x53b   :  { %4460 = vmatpush3.bf16.msra.mxu0 %v4457_v3 }
 0x53c   :  { %4462 = vmatprep.subr.bf16.mxu0 %v4461_v45 }
 0x53e   :  { %3906 = vmatmul.mubr.bf16.gmra.mrb[52].mxu0 %v5359_v38 }
 0x53f   :  { %3909 = vmatprep.mubr.bf16.mxu0 %v5362_v39  ;;  %4464 = vmatpush3.bf16.msra.mxu0 %v4461_v45  ;;  %v1581_v45 = vld [vmem:[#allocation8 + $0x48] sm:$0xff] }
 0x540   :  { %4466 = vmatprep.subr.bf16.mxu0 %v4465_v58  ;;  %v4501_v10 = vpack.c.bf16 %v1581_v45, %v1580_v37  ;;  %v2143_v37 = vld [vmem:[#allocation8 + $0x128] sm:$0xff] }
 0x543   :  { %4468 = vmatpush3.bf16.msra.mxu0 %v4465_v58  ;;  %v1582_v58 = vld [vmem:[#allocation8 + $0x50] sm:$0xff] }
 0x544   :  { %4470 = vmatprep.subr.bf16.mxu0 %v4469_v46  ;;  %v4505_v47 = vpack.c.bf16 %v1583_v59, %v1582_v58  ;;  %v2146_v59 = vld [vmem:[#allocation8 + $0x140] sm:$0xff] }
 0x546   :  { %3910 = vmatmul.mubr.bf16.gmra.mrb[56].mxu0 %v5365_v32 }
 0x547   :  { %3913 = vmatprep.mubr.bf16.mxu0 %v5368_v16  ;;  %4472 = vmatpush3.bf16.msra.mxu0 %v4469_v46 }
 0x548   :  { %4474 = vmatprep.subr.bf16.mxu0 %v4473_v25 }
 0x54b   :  { %4476 = vmatpush3.bf16.msra.mxu0 %v4473_v25 }
 0x54c   :  { %4478 = vmatprep.subr.bf16.mxu0 %v4477_v6 }
 0x54e   :  { %3914 = vmatmul.mubr.bf16.gmra.mrb[60].mxu0 %v5371_v28 }
 0x54f   :  { %4480 = vmatpush3.bf16.msra.mxu0 %v4477_v6  ;;  %v1585_v6 = vld [vmem:[#allocation8 + $0x68] sm:$0xff] }
 0x550   :  { %4482 = vmatprep.subr.bf16.mxu0 %v4481_v19  ;;  %v4509_v40 = vpack.c.bf16 %v1585_v6, %v1584_v17  ;;  %v2148_v17 = vld [vmem:[#allocation8 + $0x150] sm:$0xff]  ;;  %v2149_v6 = vld [vmem:[#allocation8 + $0x158] sm:$0xff] }
 0x553   :  { %4484 = vmatpush3.bf16.msra.mxu0 %v4481_v19  ;;  %v1586_v19 = vld [vmem:[#allocation8 + $0x70] sm:$0xff] }
 0x554   :  { %4486 = vmatprep.subr.bf16.mxu0 %v4485_v53  ;;  %v4513_v51 = vpack.c.bf16 %v1587_v20, %v1586_v19  ;;  %v2151_v19 = vld [vmem:[#allocation8 + $0x168] sm:$0xff] }
 0x609   :  { %v5374_v61 = vpop.f32.mrb[48].mxu0 }
 0x60a   :  { %v5376_v54 = vpop.f32.mrb[49].mxu0 }
 0x60b   :  { %v5378_v42 = vpop.f32.mrb[50].mxu0  ;;  %3949 = vmatprep.mubr.f32.mxu0 %v5376_v54 }
 0x60c   :  { %v2001_v55 = vpack.c.bf16 %v5378_v42, %v5374_v61  ;;  %v5383_v36 = vpop.f32.mrb[51].mxu0 }
 0x60d   :  { %v2000_v21 = vpack.c.bf16 %v5383_v36, %v5376_v54  ;;  %3950 = vmatmul.mubr.f32.vlgmr.msra.gmra.mrb[64].mxu0 %v5383_v36 }
 0x60e   :  { %3952 = vmatprep.mubr.f32.mxu0 %v5374_v61  ;;  %4488 = vmatpush3.bf16.msra.mxu0 %v4485_v53 }
 0x60f   :  { %4029 = vmatprep.subr.bf16.mxu1 %v2000_v21  ;;  %4490 = vmatprep.subr.bf16.mxu0 %v4489_v29 }
 0x610   :  { %4030 = vmatpush3.bf16.msra.mxu1 %v2000_v21 }
 0x611   :  { %v5389_v49 = vpop.f32.mrb[52].mxu0  ;;  %3953 = vmatmul.mubr.f32.gmra.mrb[66].mxu0 %v5378_v42  ;;  %4031 = vmatprep.subr.bf16.mxu1 %v2001_v55 }
 0x612   :  { %v5392_v1 = vpop.f32.mrb[53].mxu0  ;;  %4492 = vmatpush3.bf16.msra.mxu0 %v4489_v29 }
 0x613   :  { %v5394_v12 = vpop.f32.mrb[54].mxu0  ;;  %3955 = vmatprep.mubr.f32.mxu0 %v5392_v1  ;;  %4494 = vmatprep.subr.bf16.mxu0 %v4493_v43 }
 0x614   :  { %v2003_v3 = vpack.c.bf16 %v5394_v12, %v5389_v49  ;;  %v5399_v2 = vpop.f32.mrb[55].mxu0  ;;  %4032 = vmatpush3.bf16.msra.mxu1 %v2001_v55 }
 0x615   :  { %v2002_v60 = vpack.c.bf16 %v5399_v2, %v5392_v1  ;;  %3956 = vmatmul.mubr.f32.gmra.mrb[68].mxu0 %v5399_v2 }
 0x616   :  { %3958 = vmatprep.mubr.f32.mxu0 %v5389_v49  ;;  %4496 = vmatpush3.bf16.msra.mxu0 %v4493_v43  ;;  %v4517_v43 = vpack.c.bf16 %v2139_v63, %v2138_v62  ;;  %v2453_v63 = vld [vmem:[#allocation8 + $0x180] sm:$0xff] }
 0x617   :  { %4033 = vmatprep.subr.bf16.mxu1 %v2002_v60  ;;  %4498 = vmatprep.subr.bf16.mxu0 %v4497_v18 }
 0x618   :  { %4034 = vmatpush3.bf16.msra.mxu1 %v2002_v60  ;;  %v2144_v60 = vld [vmem:[#allocation8 + $0x130] sm:$0xff] }
 0x619   :  { %v5405_v5 = vpop.f32.mrb[56].mxu0  ;;  %3959 = vmatmul.mubr.f32.gmra.mrb[70].mxu0 %v5394_v12  ;;  %4035 = vmatprep.subr.bf16.mxu1 %v2003_v3 }
 0x61a   :  { %v5408_v46 = vpop.f32.mrb[57].mxu0  ;;  %4500 = vmatpush3.bf16.msra.mxu0 %v4497_v18  ;;  %v4521_v18 = vpack.c.bf16 %v2141_v0, %v2140_v44 }
 0x61b   :  { %v5410_v11 = vpop.f32.mrb[58].mxu0  ;;  %3961 = vmatprep.mubr.f32.mxu0 %v5408_v46  ;;  %4502 = vmatprep.subr.bf16.mxu0 %v4501_v10 }
 0x61c   :  { %v2005_v25 = vpack.c.bf16 %v5410_v11, %v5405_v5  ;;  %v5415_v14 = vpop.f32.mrb[59].mxu0  ;;  %4036 = vmatpush3.bf16.msra.mxu1 %v2003_v3  ;;  %v2142_v3 = vld [vmem:[#allocation8 + $0x120] sm:$0xff] }
 0x61d   :  { %v2004_v33 = vpack.c.bf16 %v5415_v14, %v5408_v46  ;;  %3962 = vmatmul.mubr.f32.gmra.mrb[72].mxu0 %v5415_v14  ;;  %v4525_v45 = vpack.c.bf16 %v2143_v37, %v2142_v3 }
 0x61e   :  { %3964 = vmatprep.mubr.f32.mxu0 %v5405_v5  ;;  %4504 = vmatpush3.bf16.msra.mxu0 %v4501_v10  ;;  %v2145_v10 = vld [vmem:[#allocation8 + $0x138] sm:$0xff] }
 0x61f   :  { %4037 = vmatprep.subr.bf16.mxu1 %v2004_v33  ;;  %4506 = vmatprep.subr.bf16.mxu0 %v4505_v47  ;;  %v4529_v58 = vpack.c.bf16 %v2145_v10, %v2144_v60  ;;  %v2455_v10 = vld [vmem:[#allocation8 + $0x190] sm:$0xff] }
 0x620   :  { %4038 = vmatpush3.bf16.msra.mxu1 %v2004_v33  ;;  %v4537_v33 = vpack.c.bf16 %v2149_v6, %v2148_v17 }
 0x621   :  { %v5421_v50 = vpop.f32.mrb[60].mxu0  ;;  %3965 = vmatmul.mubr.f32.gmra.mrb[74].mxu0 %v5410_v11  ;;  %4039 = vmatprep.subr.bf16.mxu1 %v2005_v25 }
 0x622   :  { %v5424_v53 = vpop.f32.mrb[61].mxu0  ;;  %4508 = vmatpush3.bf16.msra.mxu0 %v4505_v47  ;;  %v2147_v47 = vld [vmem:[#allocation8 + $0x148] sm:$0xff] }
 0x623   :  { %v5426_v22 = vpop.f32.mrb[62].mxu0  ;;  %3967 = vmatprep.mubr.f32.mxu0 %v5424_v53  ;;  %4510 = vmatprep.subr.bf16.mxu0 %v4509_v40 }
 0x624   :  { %v2007_v29 = vpack.c.bf16 %v5426_v22, %v5421_v50  ;;  %v5431_v55 = vpop.f32.mrb[63].mxu0  ;;  %4040 = vmatpush3.bf16.msra.mxu1 %v2005_v25  ;;  %v4533_v25 = vpack.c.bf16 %v2147_v47, %v2146_v59 }
 0x625   :  { %v2006_v21 = vpack.c.bf16 %v5431_v55, %v5424_v53  ;;  %3968 = vmatmul.mubr.f32.gmra.mrb[76].mxu0 %v5431_v55 }
 0x626   :  { %3970 = vmatprep.mubr.f32.mxu0 %v5421_v50  ;;  %4512 = vmatpush3.bf16.msra.mxu0 %v4509_v40  ;;  %v2150_v40 = vld [vmem:[#allocation8 + $0x160] sm:$0xff] }
 0x627   :  { %4041 = vmatprep.subr.bf16.mxu1 %v2006_v21  ;;  %4514 = vmatprep.subr.bf16.mxu0 %v4513_v51  ;;  %v4541_v20 = vpack.c.bf16 %v2151_v19, %v2150_v40  ;;  %v2457_v40 = vld [vmem:[#allocation8 + $0x1a0] sm:$0xff]  ;;  %v2458_v19 = vld [vmem:[#allocation8 + $0x1a8] sm:$0xff] }
 0x628   :  { %4042 = vmatpush3.bf16.msra.mxu1 %v2006_v21  ;;  %v2454_v21 = vld [vmem:[#allocation8 + $0x188] sm:$0xff] }
 0x629   :  { %3971 = vmatmul.mubr.f32.gmra.mrb[78].mxu0 %v5426_v22  ;;  %4043 = vmatprep.subr.bf16.mxu1 %v2007_v29 }
 0x62a   :  { %4516 = vmatpush3.bf16.msra.mxu0 %v4513_v51  ;;  %4005 = vmatprep.mubr.f32.mxu0 %v5293_v7  ;;  %v2152_v51 = vld [vmem:[#allocation8 + $0x170] sm:$0xff] }
 0x62b   :  { %4518 = vmatprep.subr.bf16.mxu0 %v4517_v43 }
 0x62c   :  { %4044 = vmatpush3.bf16.msra.mxu1 %v2007_v29  ;;  %v2153_v29 = vld [vmem:[#allocation8 + $0x178] sm:$0xff] }
 0x62d   :  { %4006 = vmatmul.mubr.f32.vlgmr.msra.gmra.mrb[64].mxu0 %v5291_v24  ;;  %v4545_v62 = vpack.c.bf16 %v2153_v29, %v2152_v51 }
 0x62e   :  { %4008 = vmatprep.mubr.f32.mxu0 %v5301_v31  ;;  %4520 = vmatpush3.bf16.msra.mxu0 %v4517_v43  ;;  %v4549_v43 = vpack.c.bf16 %v2454_v21, %v2453_v63 }
 0x62f   :  { %4046 = vmatmul.mubr.bf16.vlgmr.msra.gmra.mrb[32].mxu1 %v5353_v15  ;;  %4522 = vmatprep.subr.bf16.mxu0 %v4521_v18 }
 0x630   :  { %4049 = vmatprep.mubr.bf16.mxu1 %v5356_v13 }
 0x631   :  { %4009 = vmatmul.mubr.f32.gmra.mrb[66].mxu0 %v5299_v30 }
 0x632   :  { %4011 = vmatprep.mubr.f32.mxu0 %v5309_v52  ;;  %4524 = vmatpush3.bf16.msra.mxu0 %v4521_v18 }
 0x633   :  { %4526 = vmatprep.subr.bf16.mxu0 %v4525_v45 }
 0x635   :  { %4012 = vmatmul.mubr.f32.gmra.mrb[68].mxu0 %v5307_v26 }
 0x636   :  { %4014 = vmatprep.mubr.f32.mxu0 %v5317_v35  ;;  %4528 = vmatpush3.bf16.msra.mxu0 %v4525_v45 }
 0x637   :  { %4050 = vmatmul.mubr.bf16.gmra.mrb[36].mxu1 %v5359_v38  ;;  %4530 = vmatprep.subr.bf16.mxu0 %v4529_v58 }
 0x638   :  { %4053 = vmatprep.mubr.bf16.mxu1 %v5362_v39 }
 0x639   :  { %4015 = vmatmul.mubr.f32.gmra.mrb[70].mxu0 %v5315_v27 }
 0x63a   :  { %4017 = vmatprep.mubr.f32.mxu0 %v5325_v41  ;;  %4532 = vmatpush3.bf16.msra.mxu0 %v4529_v58  ;;  %v2456_v58 = vld [vmem:[#allocation8 + $0x198] sm:$0xff] }
 0x63b   :  { %4534 = vmatprep.subr.bf16.mxu0 %v4533_v25  ;;  %v4553_v6 = vpack.c.bf16 %v2456_v58, %v2455_v10  ;;  %v2462_v10 = vld [vmem:[#allocation8 + $0x1c8] sm:$0xff] }
 0x63d   :  { %4018 = vmatmul.mubr.f32.gmra.mrb[72].mxu0 %v5323_v23 }
 0x63e   :  { %4020 = vmatprep.mubr.f32.mxu0 %v5333_v8  ;;  %4536 = vmatpush3.bf16.msra.mxu0 %v4533_v25 }
 0x63f   :  { %4054 = vmatmul.mubr.bf16.gmra.mrb[40].mxu1 %v5365_v32  ;;  %4538 = vmatprep.subr.bf16.mxu0 %v4537_v33 }
 0x640   :  { %4057 = vmatprep.mubr.bf16.mxu1 %v5368_v16 }
 0x641   :  { %4021 = vmatmul.mubr.f32.gmra.mrb[74].mxu0 %v5331_v48 }
 0x642   :  { %4023 = vmatprep.mubr.f32.mxu0 %v5341_v34  ;;  %4540 = vmatpush3.bf16.msra.mxu0 %v4537_v33 }
 0x643   :  { %4542 = vmatprep.subr.bf16.mxu0 %v4541_v20 }
 0x645   :  { %4024 = vmatmul.mubr.f32.gmra.mrb[76].mxu0 %v5339_v56 }
 0x646   :  { %4026 = vmatprep.mubr.f32.mxu0 %v5349_v4  ;;  %4544 = vmatpush3.bf16.msra.mxu0 %v4541_v20 }
 0x647   :  { %4058 = vmatmul.mubr.bf16.gmra.mrb[44].mxu1 %v5371_v28  ;;  %4546 = vmatprep.subr.bf16.mxu0 %v4545_v62 }
 0x648   :  { %4133 = vmatprep.mubr.bf16.mxu1 %v5264_v57 }
 0x649   :  { %4027 = vmatmul.mubr.f32.gmra.mrb[78].mxu0 %v5347_v9 }
 0x64a   :  { %4548 = vmatpush3.bf16.msra.mxu0 %v4545_v62 }
 0x64b   :  { %4550 = vmatprep.subr.bf16.mxu0 %v4549_v43 }
 0x702   :  { %v4047_v44 = vpop.f32.mrb[32].mxu1 }
 0x703   :  { %v2042_v0 = vpop.f32.mrb[33].mxu1  ;;  %v2107_v37 = vmul.f32 2.0, %v4047_v44  ;;  %v2459_v44 = vld [vmem:[#allocation8 + $0x1b0] sm:$0xff] }
 0x704   :  { %v2105_v18 = vmul.f32 2.0, %v2042_v0  ;;  %v4048_v3 = vpop.f32.mrb[34].mxu1  ;;  %v2460_v0 = vld [vmem:[#allocation8 + $0x1b8] sm:$0xff] }
 0x705   :  { %v2108_v45 = vmul.f32 2.0, %v4048_v3  ;;  %v2045_v60 = vpop.f32.mrb[35].mxu1  ;;  %v5473_v33 = vsub.f32 %v2107_v37, %v5301_v31  ;;  %v4557_v31 = vpack.c.bf16 %v2458_v19, %v2457_v40 }
 0x706   :  { %v5463_v59 = vsub.f32 %v2105_v18, %v5293_v7  ;;  %v2106_v47 = vmul.f32 2.0, %v2045_v60 }
 0x707   :  { %v5466_v25 = vsub.f32 %v2108_v45, %v5299_v30  ;;  %v4561_v45 = vpack.c.bf16 %v2460_v0, %v2459_v44 }
 0x708   :  { %v5469_v17 = vsub.f32 %v2106_v47, %v5291_v24  ;;  %4093 = vmatprep.mubr.f32.mxu0 %v5463_v59 }
 0x709   :  { %v2316_v29 = vpack.c.bf16 %v5466_v25, %v5473_v33 }
 0x70a   :  { %v4051_v20 = vpop.f32.mrb[36].mxu1  ;;  %4094 = vmatmul.mubr.f32.vlgmr.msra.gmra.mrb[64].mxu0 %v5469_v17  ;;  %v2315_v7 = vpack.c.bf16 %v5469_v17, %v5463_v59 }
 0x70b   :  { %v2058_v51 = vpop.f32.mrb[37].mxu1  ;;  %4096 = vmatprep.mubr.f32.mxu0 %v5473_v33  ;;  %4552 = vmatpush3.bf16.msra.mxu0 %v4549_v43  ;;  %v2111_v62 = vmul.f32 2.0, %v4051_v20 }
 0x70c   :  { %v2109_v24 = vmul.f32 2.0, %v2058_v51  ;;  %v4052_v30 = vpop.f32.mrb[38].mxu1  ;;  %4117 = vmatprep.subr.bf16.mxu1 %v2315_v7  ;;  %4554 = vmatprep.subr.bf16.mxu0 %v4553_v6  ;;  %v2463_v51 = vld [vmem:[#allocation8 + $0x1d0] sm:$0xff] }
 0x70d   :  { %v2112_v63 = vmul.f32 2.0, %v4052_v30  ;;  %v2061_v21 = vpop.f32.mrb[39].mxu1  ;;  %4118 = vmatpush3.bf16.msra.mxu1 %v2315_v7  ;;  %v5493_v60 = vsub.f32 %v2111_v62, %v5317_v35 }
 0x70e   :  { %v5482_v18 = vsub.f32 %v2109_v24, %v5309_v52  ;;  %v2110_v3 = vmul.f32 2.0, %v2061_v21  ;;  %4097 = vmatmul.mubr.f32.gmra.mrb[66].mxu0 %v5466_v25  ;;  %4119 = vmatprep.subr.bf16.mxu1 %v2316_v29  ;;  %v2461_v52 = vld [vmem:[#allocation8 + $0x1c0] sm:$0xff]  ;;  %v2464_v24 = vld [vmem:[#allocation8 + $0x1d8] sm:$0xff] }
 0x70f   :  { %4556 = vmatpush3.bf16.msra.mxu0 %v4553_v6  ;;  %v5486_v43 = vsub.f32 %v2112_v63, %v5315_v27  ;;  %v4565_v40 = vpack.c.bf16 %v2462_v10, %v2461_v52  ;;  %v4569_v63 = vpack.c.bf16 %v2464_v24, %v2463_v51 }
 0x710   :  { %v5489_v37 = vsub.f32 %v2110_v3, %v5307_v26  ;;  %4099 = vmatprep.mubr.f32.mxu0 %v5482_v18  ;;  %4558 = vmatprep.subr.bf16.mxu0 %v4557_v31 }
 0x711   :  { %4120 = vmatpush3.bf16.msra.mxu1 %v2316_v29  ;;  %v2318_v35 = vpack.c.bf16 %v5486_v43, %v5493_v60 }
 0x712   :  { %v4055_v58 = vpop.f32.mrb[40].mxu1  ;;  %4100 = vmatmul.mubr.f32.gmra.mrb[68].mxu0 %v5489_v37  ;;  %v2317_v27 = vpack.c.bf16 %v5489_v37, %v5482_v18 }
 0x713   :  { %v2074_v47 = vpop.f32.mrb[41].mxu1  ;;  %4102 = vmatprep.mubr.f32.mxu0 %v5493_v60  ;;  %4560 = vmatpush3.bf16.msra.mxu0 %v4557_v31  ;;  %v2115_v19 = vmul.f32 2.0, %v4055_v58 }
 0x714   :  { %v2113_v26 = vmul.f32 2.0, %v2074_v47  ;;  %v4056_v6 = vpop.f32.mrb[42].mxu1  ;;  %4121 = vmatprep.subr.bf16.mxu1 %v2317_v27  ;;  %4562 = vmatprep.subr.bf16.mxu0 %v4561_v45 }
 0x715   :  { %v2116_v20 = vmul.f32 2.0, %v4056_v6  ;;  %v2077_v7 = vpop.f32.mrb[43].mxu1  ;;  %4122 = vmatpush3.bf16.msra.mxu1 %v2317_v27  ;;  %v5513_v21 = vsub.f32 %v2115_v19, %v5333_v8 }
 0x716   :  { %v5502_v30 = vsub.f32 %v2113_v26, %v5325_v41  ;;  %v2114_v29 = vmul.f32 2.0, %v2077_v7  ;;  %4103 = vmatmul.mubr.f32.gmra.mrb[70].mxu0 %v5486_v43  ;;  %4123 = vmatprep.subr.bf16.mxu1 %v2318_v35  ;;  %v2769_v7 = vld [vmem:[#allocation8 + $0x208] sm:$0xff] }
 0x717   :  { %4564 = vmatpush3.bf16.msra.mxu0 %v4561_v45  ;;  %v5506_v31 = vsub.f32 %v2116_v20, %v5331_v48  ;;  %v2768_v20 = vld [vmem:[#allocation8 + $0x200] sm:$0xff] }
 0x718   :  { %v5509_v62 = vsub.f32 %v2114_v29, %v5323_v23  ;;  %4105 = vmatprep.mubr.f32.mxu0 %v5502_v30  ;;  %4566 = vmatprep.subr.bf16.mxu0 %v4565_v40  ;;  %v4581_v51 = vpack.c.bf16 %v2769_v7, %v2768_v20 }
 0x719   :  { %4124 = vmatpush3.bf16.msra.mxu1 %v2318_v35  ;;  %v2320_v3 = vpack.c.bf16 %v5506_v31, %v5513_v21  ;;  %v2467_v35 = vld [vmem:[#allocation8 + $0x1f0] sm:$0xff] }
 0x71a   :  { %v4059_v41 = vpop.f32.mrb[44].mxu1  ;;  %4106 = vmatmul.mubr.f32.gmra.mrb[72].mxu0 %v5509_v62  ;;  %v2319_v44 = vpack.c.bf16 %v5509_v62, %v5502_v30 }
 0x71b   :  { %v2090_v0 = vpop.f32.mrb[45].mxu1  ;;  %4108 = vmatprep.mubr.f32.mxu0 %v5513_v21  ;;  %4568 = vmatpush3.bf16.msra.mxu0 %v4565_v40  ;;  %v2119_v8 = vmul.f32 2.0, %v4059_v41  ;;  %v2468_v40 = vld [vmem:[#allocation8 + $0x1f8] sm:$0xff] }
 0x71c   :  { %v2117_v23 = vmul.f32 2.0, %v2090_v0  ;;  %v4060_v48 = vpop.f32.mrb[46].mxu1  ;;  %4125 = vmatprep.subr.bf16.mxu1 %v2319_v44  ;;  %4570 = vmatprep.subr.bf16.mxu0 %v4569_v63  ;;  %v4577_v19 = vpack.c.bf16 %v2468_v40, %v2467_v35 }
 0x71d   :  { %v2120_v45 = vmul.f32 2.0, %v4060_v48  ;;  %v2093_v52 = vpop.f32.mrb[47].mxu1  ;;  %4126 = vmatpush3.bf16.msra.mxu1 %v2319_v44  ;;  %v5533_v26 = vsub.f32 %v2119_v8, %v5349_v4  ;;  %v2466_v4 = vld [vmem:[#allocation8 + $0x1e8] sm:$0xff]  ;;  %v2770_v48 = vld [vmem:[#allocation8 + $0x210] sm:$0xff] }
 0x71e   :  { %v5522_v10 = vsub.f32 %v2117_v23, %v5341_v34  ;;  %v2118_v58 = vmul.f32 2.0, %v2093_v52  ;;  %4109 = vmatmul.mubr.f32.gmra.mrb[74].mxu0 %v5506_v31  ;;  %4127 = vmatprep.subr.bf16.mxu1 %v2320_v3 }
 0x71f   :  { %4572 = vmatpush3.bf16.msra.mxu0 %v4569_v63  ;;  %v5526_v27 = vsub.f32 %v2120_v45, %v5347_v9 }
 0x720   :  { %v5529_v47 = vsub.f32 %v2118_v58, %v5339_v56  ;;  %4111 = vmatprep.mubr.f32.mxu0 %v5522_v10  ;;  %v2465_v56 = vld [vmem:[#allocation8 + $0x1e0] sm:$0xff] }
 0x721   :  { %4128 = vmatpush3.bf16.msra.mxu1 %v2320_v3  ;;  %v2322_v9 = vpack.c.bf16 %v5526_v27, %v5533_v26  ;;  %v4573_v6 = vpack.c.bf16 %v2466_v4, %v2465_v56  ;;  %v2771_v3 = vld [vmem:[#allocation8 + $0x218] sm:$0xff]  ;;  %v2772_v56 = vld [vmem:[#allocation8 + $0x220] sm:$0xff]  ;;  %v2773_v4 = vld [vmem:[#allocation8 + $0x228] sm:$0xff] }
 0x722   :  { %4112 = vmatmul.mubr.f32.gmra.mrb[76].mxu0 %v5529_v47  ;;  %v2321_v34 = vpack.c.bf16 %v5529_v47, %v5522_v10 }
 0x723   :  { %4114 = vmatprep.mubr.f32.mxu0 %v5533_v26  ;;  %4574 = vmatprep.subr.bf16.mxu0 %v4573_v6 }
 0x724   :  { %4129 = vmatprep.subr.bf16.mxu1 %v2321_v34  ;;  %4576 = vmatpush3.bf16.msra.mxu0 %v4573_v6 }
 0x725   :  { %4130 = vmatpush3.bf16.msra.mxu1 %v2321_v34  ;;  %4578 = vmatprep.subr.bf16.mxu0 %v4577_v19  ;;  %v4585_v34 = vpack.c.bf16 %v2771_v3, %v2770_v48 }
 0x726   :  { %4115 = vmatmul.mubr.f32.gmra.mrb[78].mxu0 %v5526_v27  ;;  %4131 = vmatprep.subr.bf16.mxu1 %v2322_v9 }
 0x728   :  { %4580 = vmatpush3.bf16.msra.mxu0 %v4577_v19 }
 0x729   :  { %4132 = vmatpush3.bf16.msra.mxu1 %v2322_v9  ;;  %4582 = vmatprep.subr.bf16.mxu0 %v4581_v51 }
 0x72c   :  { %4134 = vmatmul.mubr.bf16.vlgmr.msra.gmra.mrb[48].mxu1 %v5353_v15 }
 0x72d   :  { %4137 = vmatprep.mubr.bf16.mxu1 %v5356_v13 }
 0x734   :  { %4138 = vmatmul.mubr.bf16.gmra.mrb[52].mxu1 %v5359_v38 }
 0x735   :  { %4141 = vmatprep.mubr.bf16.mxu1 %v5362_v39 }
 0x73c   :  { %4142 = vmatmul.mubr.bf16.gmra.mrb[56].mxu1 %v5365_v32 }
 0x73d   :  { %4145 = vmatprep.mubr.bf16.mxu1 %v5368_v16 }
 0x744   :  { %4146 = vmatmul.mubr.bf16.gmra.mrb[60].mxu1 %v5371_v28 }
 0x745   :  { %4221 = vmatprep.mubr.bf16.mxu1 %v5264_v57 }
 0x7ff   :  { %v4135_v24 = vpop.f32.mrb[48].mxu1 }
 0x800   :  { %v2422_v29 = vmul.f32 2.0, %v4135_v24  ;;  %v2357_v63 = vpop.f32.mrb[49].mxu1  ;;  %v2774_v24 = vld [vmem:[#allocation8 + $0x230] sm:$0xff] }
 0x801   :  { %v2420_v41 = vmul.f32 2.0, %v2357_v63  ;;  %v4136_v44 = vpop.f32.mrb[50].mxu1 }
 0x802   :  { %v2438_v57 = vsub.f32 %v2422_v29, %v5374_v61  ;;  %v2423_v0 = vmul.f32 2.0, %v4136_v44  ;;  %v2360_v23 = vpop.f32.mrb[51].mxu1  ;;  %v2775_v29 = vld [vmem:[#allocation8 + $0x238] sm:$0xff] }
 0x803   :  { %v2436_v8 = vsub.f32 %v2420_v41, %v5376_v54  ;;  %v2421_v45 = vmul.f32 2.0, %v2360_v23  ;;  %v4589_v54 = vpack.c.bf16 %v2773_v4, %v2772_v56  ;;  %v2777_v23 = vld [vmem:[#allocation8 + $0x248] sm:$0xff]  ;;  %v2779_v56 = vld [vmem:[#allocation8 + $0x258] sm:$0xff] }
 0x804   :  { %v2439_v52 = vsub.f32 %v2423_v0, %v5378_v42  ;;  %v2776_v0 = vld [vmem:[#allocation8 + $0x240] sm:$0xff] }
 0x805   :  { %v2437_v58 = vsub.f32 %v2421_v45, %v5383_v36  ;;  %4181 = vmatprep.mubr.f32.mxu0 %v2436_v8 }
 0x806   :  { %v2631_v9 = vpack.c.bf16 %v2439_v52, %v2438_v57 }
 0x807   :  { %v4139_v6 = vpop.f32.mrb[52].mxu1  ;;  %4182 = vmatmul.mubr.f32.vlgmr.msra.gmra.mrb[64].mxu0 %v2437_v58  ;;  %v2630_v35 = vpack.c.bf16 %v2437_v58, %v2436_v8 }
 0x808   :  { %v2426_v61 = vmul.f32 2.0, %v4139_v6  ;;  %v2373_v40 = vpop.f32.mrb[53].mxu1  ;;  %4184 = vmatprep.mubr.f32.mxu0 %v2438_v57  ;;  %4584 = vmatpush3.bf16.msra.mxu0 %v4581_v51  ;;  %v4593_v57 = vpack.c.bf16 %v2775_v29, %v2774_v24 }
 0x809   :  { %v2424_v19 = vmul.f32 2.0, %v2373_v40  ;;  %v4140_v20 = vpop.f32.mrb[54].mxu1  ;;  %4205 = vmatprep.subr.bf16.mxu1 %v2630_v35  ;;  %4586 = vmatprep.subr.bf16.mxu0 %v4585_v34 }
 0x80a   :  { %v2442_v42 = vsub.f32 %v2426_v61, %v5389_v49  ;;  %v2427_v36 = vmul.f32 2.0, %v4140_v20  ;;  %v2376_v7 = vpop.f32.mrb[55].mxu1  ;;  %4206 = vmatpush3.bf16.msra.mxu1 %v2630_v35 }
 0x80b   :  { %v2440_v63 = vsub.f32 %v2424_v19, %v5392_v1  ;;  %v2425_v41 = vmul.f32 2.0, %v2376_v7  ;;  %4185 = vmatmul.mubr.f32.gmra.mrb[66].mxu0 %v2439_v52  ;;  %4207 = vmatprep.subr.bf16.mxu1 %v2631_v9 }
 0x80c   :  { %v2443_v44 = vsub.f32 %v2427_v36, %v5394_v12  ;;  %4588 = vmatpush3.bf16.msra.mxu0 %v4585_v34  ;;  %v4597_v12 = vpack.c.bf16 %v2777_v23, %v2776_v0 }
 0x80d   :  { %v2441_v51 = vsub.f32 %v2425_v41, %v5399_v2  ;;  %4187 = vmatprep.mubr.f32.mxu0 %v2440_v63  ;;  %4590 = vmatprep.subr.bf16.mxu0 %v4589_v54 }
 0x80e   :  { %4208 = vmatpush3.bf16.msra.mxu1 %v2631_v9  ;;  %v2633_v49 = vpack.c.bf16 %v2443_v44, %v2442_v42  ;;  %v2778_v9 = vld [vmem:[#allocation8 + $0x250] sm:$0xff] }
 0x80f   :  { %v4143_v48 = vpop.f32.mrb[56].mxu1  ;;  %4188 = vmatmul.mubr.f32.gmra.mrb[68].mxu0 %v2441_v51  ;;  %v2632_v3 = vpack.c.bf16 %v2441_v51, %v2440_v63  ;;  %v4601_v40 = vpack.c.bf16 %v2779_v56, %v2778_v9 }
 0x810   :  { %v2430_v8 = vmul.f32 2.0, %v4143_v48  ;;  %v2389_v1 = vpop.f32.mrb[57].mxu1  ;;  %4190 = vmatprep.mubr.f32.mxu0 %v2442_v42  ;;  %4592 = vmatpush3.bf16.msra.mxu0 %v4589_v54 }
 0x811   :  { %v2428_v45 = vmul.f32 2.0, %v2389_v1  ;;  %v4144_v52 = vpop.f32.mrb[58].mxu1  ;;  %4209 = vmatprep.subr.bf16.mxu1 %v2632_v3  ;;  %4594 = vmatprep.subr.bf16.mxu0 %v4593_v57 }
 0x812   :  { %v2446_v2 = vsub.f32 %v2430_v8, %v5405_v5  ;;  %v2431_v58 = vmul.f32 2.0, %v4144_v52  ;;  %v2392_v34 = vpop.f32.mrb[59].mxu1  ;;  %4210 = vmatpush3.bf16.msra.mxu1 %v2632_v3 }
 0x813   :  { %v2444_v4 = vsub.f32 %v2428_v45, %v5408_v46  ;;  %v2429_v6 = vmul.f32 2.0, %v2392_v34  ;;  %4191 = vmatmul.mubr.f32.gmra.mrb[70].mxu0 %v2443_v44  ;;  %4211 = vmatprep.subr.bf16.mxu1 %v2633_v49 }
 0x814   :  { %v2447_v35 = vsub.f32 %v2431_v58, %v5410_v11  ;;  %4596 = vmatpush3.bf16.msra.mxu0 %v4593_v57  ;;  %v2783_v57 = vld [vmem:[#allocation8 + $0x278] sm:$0xff] }
 0x815   :  { %v2445_v61 = vsub.f32 %v2429_v6, %v5415_v14  ;;  %4193 = vmatprep.mubr.f32.mxu0 %v2444_v4  ;;  %4598 = vmatprep.subr.bf16.mxu0 %v4597_v12 }
 0x816   :  { %4212 = vmatpush3.bf16.msra.mxu1 %v2633_v49  ;;  %v2635_v5 = vpack.c.bf16 %v2447_v35, %v2446_v2 }
 0x817   :  { %v4147_v19 = vpop.f32.mrb[60].mxu1  ;;  %4194 = vmatmul.mubr.f32.gmra.mrb[72].mxu0 %v2445_v61  ;;  %v2634_v20 = vpack.c.bf16 %v2445_v61, %v2444_v4 }
 0x818   :  { %v2434_v54 = vmul.f32 2.0, %v4147_v19  ;;  %v2405_v42 = vpop.f32.mrb[61].mxu1  ;;  %4196 = vmatprep.mubr.f32.mxu0 %v2446_v2  ;;  %4600 = vmatpush3.bf16.msra.mxu0 %v4597_v12 }
 0x819   :  { %v2432_v46 = vmul.f32 2.0, %v2405_v42  ;;  %v4148_v36 = vpop.f32.mrb[62].mxu1  ;;  %4213 = vmatprep.subr.bf16.mxu1 %v2634_v20  ;;  %4602 = vmatprep.subr.bf16.mxu0 %v4601_v40 }
 0x81a   :  { %v2450_v11 = vsub.f32 %v2434_v54, %v5421_v50  ;;  %v2435_v7 = vmul.f32 2.0, %v4148_v36  ;;  %v2408_v14 = vpop.f32.mrb[63].mxu1  ;;  %4214 = vmatpush3.bf16.msra.mxu1 %v2634_v20  ;;  %v2780_v50 = vld [vmem:[#allocation8 + $0x260] sm:$0xff] }
 0x81b   :  { %v2448_v24 = vsub.f32 %v2432_v46, %v5424_v53  ;;  %v2433_v29 = vmul.f32 2.0, %v2408_v14  ;;  %4197 = vmatmul.mubr.f32.gmra.mrb[74].mxu0 %v2447_v35  ;;  %4215 = vmatprep.subr.bf16.mxu1 %v2635_v5  ;;  %v2781_v53 = vld [vmem:[#allocation8 + $0x268] sm:$0xff] }
 0x81c   :  { %v2451_v63 = vsub.f32 %v2435_v7, %v5426_v22  ;;  %4604 = vmatpush3.bf16.msra.mxu0 %v4601_v40  ;;  %v4605_v22 = vpack.c.bf16 %v2781_v53, %v2780_v50 }
 0x81d   :  { %v2449_v41 = vsub.f32 %v2433_v29, %v5431_v55  ;;  %4199 = vmatprep.mubr.f32.mxu0 %v2448_v24  ;;  %v2782_v55 = vld [vmem:[#allocation8 + $0x270] sm:$0xff] }
 0x81e   :  { %4216 = vmatpush3.bf16.msra.mxu1 %v2635_v5  ;;  %v2637_v44 = vpack.c.bf16 %v2451_v63, %v2450_v11  ;;  %4606 = vmatprep.subr.bf16.mxu0 %v4605_v22 }
 0x81f   :  { %4200 = vmatmul.mubr.f32.gmra.mrb[76].mxu0 %v2449_v41  ;;  %v2636_v51 = vpack.c.bf16 %v2449_v41, %v2448_v24 }
 0x820   :  { %4202 = vmatprep.mubr.f32.mxu0 %v2450_v11  ;;  %4608 = vmatpush3.bf16.msra.mxu0 %v4605_v22 }
 0x821   :  { %4217 = vmatprep.subr.bf16.mxu1 %v2636_v51 }
 0x822   :  { %4218 = vmatpush3.bf16.msra.mxu1 %v2636_v51 }
 0x823   :  { %4203 = vmatmul.mubr.f32.gmra.mrb[78].mxu0 %v2451_v63  ;;  %4219 = vmatprep.subr.bf16.mxu1 %v2637_v44 }
 0x826   :  { %4220 = vmatpush3.bf16.msra.mxu1 %v2637_v44 }
 0x829   :  { %4222 = vmatmul.mubr.bf16.vlgmr.msra.gmra.mrb[64].mxu1 %v5353_v15  ;;  %v4609_v15 = vpack.c.bf16 %v2783_v57, %v2782_v55 }
 0x82a   :  { %4225 = vmatprep.mubr.bf16.mxu1 %v5356_v13 }
 0x82b   :  { %4610 = vmatprep.subr.bf16.mxu0 %v4609_v15 }
 0x82c   :  { %4612 = vmatpush3.bf16.msra.mxu0 %v4609_v15 }
 0x831   :  { %4226 = vmatmul.mubr.bf16.gmra.mrb[68].mxu1 %v5359_v38 }
 0x832   :  { %4229 = vmatprep.mubr.bf16.mxu1 %v5362_v39 }
 0x839   :  { %4230 = vmatmul.mubr.bf16.gmra.mrb[72].mxu1 %v5365_v32 }
 0x83a   :  { %4233 = vmatprep.mubr.bf16.mxu1 %v5368_v16 }
 0x841   :  { %4234 = vmatmul.mubr.bf16.gmra.mrb[76].mxu1 %v5371_v28 }
 0x8fc   :  { %v4223_v13 = vpop.f32.mrb[64].mxu1 }
 0x8fd   :  { %v2672_v38 = vpop.f32.mrb[65].mxu1  ;;  %v2737_v0 = vmul.f32 2.0, %v4223_v13 }
 0x8fe   :  { %v2735_v49 = vmul.f32 2.0, %v2672_v38  ;;  %v4224_v39 = vpop.f32.mrb[66].mxu1 }
 0x8ff   :  { %v2675_v32 = vpop.f32.mrb[67].mxu1  ;;  %v2738_v28 = vmul.f32 2.0, %v4224_v39  ;;  %v2753_v3 = vsub.f32 %v2737_v0, %v5473_v33 }
 0x900   :  { %v2751_v16 = vsub.f32 %v2735_v49, %v5463_v59  ;;  %v2736_v23 = vmul.f32 2.0, %v2675_v32 }
 0x901   :  { %v2754_v45 = vsub.f32 %v2738_v28, %v5466_v25 }
 0x902   :  { %v2752_v48 = vsub.f32 %v2736_v23, %v5469_v17  ;;  %4269 = vmatprep.mubr.f32.mxu0 %v2751_v16 }
 0x904   :  { %v4227_v8 = vpop.f32.mrb[68].mxu1  ;;  %4270 = vmatmul.mubr.f32.vlgmr.msra.gmra.mrb[64].mxu0 %v2752_v48 }
 0x905   :  { %v2688_v1 = vpop.f32.mrb[69].mxu1  ;;  %4272 = vmatprep.mubr.f32.mxu0 %v2753_v3  ;;  %v2741_v2 = vmul.f32 2.0, %v4227_v8 }
 0x906   :  { %v2739_v52 = vmul.f32 2.0, %v2688_v1  ;;  %v4228_v12 = vpop.f32.mrb[70].mxu1 }
 0x907   :  { %v2691_v58 = vpop.f32.mrb[71].mxu1  ;;  %v2742_v9 = vmul.f32 2.0, %v4228_v12  ;;  %v2757_v33 = vsub.f32 %v2741_v2, %v5493_v60 }
 0x908   :  { %v2755_v34 = vsub.f32 %v2739_v52, %v5482_v18  ;;  %v2740_v59 = vmul.f32 2.0, %v2691_v58  ;;  %4273 = vmatmul.mubr.f32.gmra.mrb[66].mxu0 %v2754_v45 }
 0x909   :  { %v2758_v25 = vsub.f32 %v2742_v9, %v5486_v43 }
 0x90a   :  { %v2756_v17 = vsub.f32 %v2740_v59, %v5489_v37  ;;  %4275 = vmatprep.mubr.f32.mxu0 %v2755_v34 }
 0x90c   :  { %v4231_v56 = vpop.f32.mrb[72].mxu1  ;;  %4276 = vmatmul.mubr.f32.gmra.mrb[68].mxu0 %v2756_v17 }
 0x90d   :  { %v2704_v4 = vpop.f32.mrb[73].mxu1  ;;  %4278 = vmatprep.mubr.f32.mxu0 %v2757_v33  ;;  %v2745_v61 = vmul.f32 2.0, %v4231_v56 }
 0x90e   :  { %v2743_v6 = vmul.f32 2.0, %v2704_v4  ;;  %v4232_v35 = vpop.f32.mrb[74].mxu1 }
 0x90f   :  { %v2707_v40 = vpop.f32.mrb[75].mxu1  ;;  %v2746_v19 = vmul.f32 2.0, %v4232_v35  ;;  %v2761_v60 = vsub.f32 %v2745_v61, %v5513_v21 }
 0x910   :  { %v2759_v18 = vsub.f32 %v2743_v6, %v5502_v30  ;;  %v2744_v5 = vmul.f32 2.0, %v2707_v40  ;;  %4279 = vmatmul.mubr.f32.gmra.mrb[70].mxu0 %v2758_v25 }
 0x911   :  { %v2762_v43 = vsub.f32 %v2746_v19, %v5506_v31  ;;  %v3028_v31 = vld [vmem:[%s5612_s5] ss:$0 sm:$0xff]  ;;  %s4892_s5 = smov [#allocation10]  }
 0x912   :  { %v2760_v37 = vsub.f32 %v2744_v5, %v5509_v62  ;;  %4281 = vmatprep.mubr.f32.mxu0 %v2759_v18  ;;  %s3005_s25 = sshll.u32 %s4892_s5, 4  ;;  %s3006_s25 = int_to_ptr.vmem [resolvable:$true] %s3005_s25 }
 0x913   :  { %s4854_s26 = scalar_lea.vmem %s3006_s25, 2048  ;;  %p4859_p5 = scmp.lt.s32.totalorder %s3006_s25, %s3006_s25 }
 0x914   :  { %v4235_v20 = vpop.f32.mrb[76].mxu1  ;;  %4282 = vmatmul.mubr.f32.gmra.mrb[72].mxu0 %v2760_v37  ;;  %p4855_p4 = scmp.ne.s32.totalorder %s3006_s25, %s4854_s26  ;;  %p4860_p6 = scmp.lt.s32.totalorder %s4854_s26, %s4854_s26 }
 0x915   :  { %v2720_v54 = vpop.f32.mrb[77].mxu1  ;;  %4284 = vmatprep.mubr.f32.mxu0 %v2761_v60  ;;  %v2749_v36 = vmul.f32 2.0, %v4235_v20 }
 0x916   :  { %v2747_v42 = vmul.f32 2.0, %v2720_v54  ;;  %v4236_v46 = vpop.f32.mrb[78].mxu1  ;;  %p4861_p7 = por %p4860_p6, %p4859_p5 }
 0x917   :  { %v2723_v11 = vpop.f32.mrb[79].mxu1  ;;  %v2750_v14 = vmul.f32 2.0, %v4236_v46  ;;  %v2765_v21 = vsub.f32 %v2749_v36, %v5533_v26 }
 0x918   :  { %v2763_v30 = vsub.f32 %v2747_v42, %v5522_v10  ;;  %v2748_v7 = vmul.f32 2.0, %v2723_v11  ;;  %4285 = vmatmul.mubr.f32.gmra.mrb[74].mxu0 %v2762_v43  ;;  %p4862_p8 = pnand %p4861_p7, %p4855_p4 }
 0x919   :  { %v2766_v24 = vsub.f32 %v2750_v14, %v5526_v27 }
 0x91a   :  { %v2764_v62 = vsub.f32 %v2748_v7, %v5529_v47  ;;  %4287 = vmatprep.mubr.f32.mxu0 %v2763_v30 }
 0x91c   :  { %4288 = vmatmul.mubr.f32.gmra.mrb[76].mxu0 %v2764_v62 }
 0x91d   :  { %4290 = vmatprep.mubr.f32.mxu0 %v2765_v21 }
 0x920   :  { %4291 = vmatmul.mubr.f32.gmra.mrb[78].mxu0 %v2766_v24 }
 0x9d7   :  { %v4271_v29 = vpop.f32.mrb[64].mxu0 }
 0x9d8   :  { %v2953_v63 = vadd.f32 %v4271_v29, %v3028_v31  ;;  %v2850_v10 = vpop.f32.mrb[65].mxu0 }
 0x9d9   :  { %v2952_v41 = vadd.f32 %v3028_v31, %v2850_v10 }
 0x9da   :  { %v2969_v44 = vmax.f32 %v2953_v63, 0.0 }
 0x9db   :  { %v2968_v51 = vmax.f32 %v2952_v41, 0.0  ;;  %v4274_v50 = vpop.f32.mrb[66].mxu0 }
 0x9dc   :  { %2985 = vst [vmem:[#allocation10 + $0x8] sm:$0xff] %v2969_v44  ;;  %v2955_v47 = vadd.f32 %v4274_v50, %v3028_v31  ;;  %v2860_v53 = vpop.f32.mrb[67].mxu0 }
 0x9dd   :  { %2984 = vst [vmem:[#allocation10] sm:$0xff] %v2968_v51  ;;  %v2954_v26 = vadd.f32 %v3028_v31, %v2860_v53 }
 0x9de   :  { %v2971_v22 = vmax.f32 %v2955_v47, 0.0 }
 0x9df   :  { %v2970_v55 = vmax.f32 %v2954_v26, 0.0  ;;  %v4277_v27 = vpop.f32.mrb[68].mxu0 }
 0x9e0   :  { %2987 = vst [vmem:[#allocation10 + $0x18] sm:$0xff] %v2971_v22  ;;  %v2957_v57 = vadd.f32 %v4277_v27, %v3028_v31  ;;  %v2870_v15 = vpop.f32.mrb[69].mxu0 }
 0x9e1   :  { %2986 = vst [vmem:[#allocation10 + $0x10] sm:$0xff] %v2970_v55  ;;  %v2956_v13 = vadd.f32 %v3028_v31, %v2870_v15 }
 0x9e2   :  { %v2973_v38 = vmax.f32 %v2957_v57, 0.0 }
 0x9e3   :  { %v2972_v49 = vmax.f32 %v2956_v13, 0.0  ;;  %v4280_v39 = vpop.f32.mrb[70].mxu0 }
 0x9e4   :  { %2989 = vst [vmem:[#allocation10 + $0x28] sm:$0xff] %v2973_v38  ;;  %v2959_v0 = vadd.f32 %v4280_v39, %v3028_v31  ;;  %v2880_v32 = vpop.f32.mrb[71].mxu0 }
 0x9e5   :  { %2988 = vst [vmem:[#allocation10 + $0x20] sm:$0xff] %v2972_v49  ;;  %v2958_v16 = vadd.f32 %v3028_v31, %v2880_v32 }
 0x9e6   :  { %v2975_v23 = vmax.f32 %v2959_v0, 0.0 }
 0x9e7   :  { %v2974_v28 = vmax.f32 %v2958_v16, 0.0  ;;  %v4283_v48 = vpop.f32.mrb[72].mxu0 }
 0x9e8   :  { %2991 = vst [vmem:[#allocation10 + $0x38] sm:$0xff] %v2975_v23  ;;  %v2961_v3 = vadd.f32 %v4283_v48, %v3028_v31  ;;  %v2890_v8 = vpop.f32.mrb[73].mxu0 }
 0x9e9   :  { %2990 = vst [vmem:[#allocation10 + $0x30] sm:$0xff] %v2974_v28  ;;  %v2960_v1 = vadd.f32 %v3028_v31, %v2890_v8 }
 0x9ea   :  { %v2977_v45 = vmax.f32 %v2961_v3, 0.0 }
 0x9eb   :  { %v2976_v52 = vmax.f32 %v2960_v1, 0.0  ;;  %v4286_v12 = vpop.f32.mrb[74].mxu0 }
 0x9ec   :  { %2993 = vst [vmem:[#allocation10 + $0x48] sm:$0xff] %v2977_v45  ;;  %v2963_v2 = vadd.f32 %v4286_v12, %v3028_v31  ;;  %v2900_v58 = vpop.f32.mrb[75].mxu0 }
 0x9ed   :  { %2992 = vst [vmem:[#allocation10 + $0x40] sm:$0xff] %v2976_v52  ;;  %v2962_v34 = vadd.f32 %v3028_v31, %v2900_v58 }
 0x9ee   :  { %v2979_v59 = vmax.f32 %v2963_v2, 0.0 }
 0x9ef   :  { %v2978_v9 = vmax.f32 %v2962_v34, 0.0  ;;  %v4289_v17 = vpop.f32.mrb[76].mxu0 }
 0x9f0   :  { %2995 = vst [vmem:[#allocation10 + $0x58] sm:$0xff] %v2979_v59  ;;  %v2965_v33 = vadd.f32 %v4289_v17, %v3028_v31  ;;  %v2910_v56 = vpop.f32.mrb[77].mxu0 }
 0x9f1   :  { %2994 = vst [vmem:[#allocation10 + $0x50] sm:$0xff] %v2978_v9  ;;  %v2964_v4 = vadd.f32 %v3028_v31, %v2910_v56 }
 0x9f2   :  { %v2981_v25 = vmax.f32 %v2965_v33, 0.0 }
 0x9f3   :  { %v2980_v6 = vmax.f32 %v2964_v4, 0.0  ;;  %v4292_v35 = vpop.f32.mrb[78].mxu0 }
 0x9f4   :  { %2997 = vst [vmem:[#allocation10 + $0x68] sm:$0xff] %v2981_v25  ;;  %v2967_v61 = vadd.f32 %v4292_v35, %v3028_v31  ;;  %v2920_v40 = vpop.f32.mrb[79].mxu0 }
 0x9f5   :  { %2996 = vst [vmem:[#allocation10 + $0x60] sm:$0xff] %v2980_v6  ;;  %v2966_v18 = vadd.f32 %v3028_v31, %v2920_v40 }
 0x9f6   :  { %v2983_v5 = vmax.f32 %v2967_v61, 0.0 }
 0x9f7   :  { %v2982_v19 = vmax.f32 %v2966_v18, 0.0 }
 0x9f8   :  { %2999 = vst [vmem:[#allocation10 + $0x78] sm:$0xff] %v2983_v5 }
 0x9f9   :  { %2998 = vst [vmem:[#allocation10 + $0x70] sm:$0xff] %v2982_v19 }
 0x9fa   :  { %4865 = shalt.err (!%p4862_p8)
}
 0x9fb   :  { %s4866_s29 = scalar_lea.hbm %s5613_s6, 2048 }
 0x9fc   :  { %p4867_p9 = scmp.ne.s32.totalorder %s5613_s6, %s4866_s29  ;;  %p4870_p10 = scmp.lt.u32.totalorder %s4866_s29, %s5613_s6 }
 0x9fe   :  { %p4872_p11 = pnand %p4870_p10, %p4867_p9 }
 0xa00   :  { %4875 = shalt.err (!%p4872_p11)
}
 0xa01   :  { %3011 = dma.vmem_to_hbm [thread:$0]  %s3006_s25, 2048, %s5613_s6, [#allocation4], %s4885_s7, %s4885_s7, %s4886_s8  }
 0xa02   :  { %4882 = dma.done.wait [#allocation4], 2048  }
 0xa03   :  { %4883 = vsyncadd [#allocation4], 4294965248 }
 0xa04   :  { %3015 = vsyncpa [#allocation3], 1 }
 0xa05   :  { %3016 = vsyncpa [#allocation6], 1 }
 0xa06   :  { %3017 = vsyncpa [#allocation9], 1 }
 0xa07   :  { %3018 = vsyncpa [#allocation4], 1 }

</bundles_post_ra>
